<compile_context>
chip_gen: v5e
topology: v5e:2x2
jax: 0.10.0
libtpu: 0.0.40
codegen_flags: <defaults>
</compile_context>

<pallas_src>
import numpy as np
import jax
import jax.numpy as jnp
from jax import lax
from jax.experimental import pallas as pl
from jax.experimental.pallas import tpu as pltpu


def _bilinear_matrix(in_size, out_size):
    """Interpolation matrix matching torch.nn.Upsample(mode='bilinear', align_corners=False)."""
    scale = in_size / out_size
    i = np.arange(out_size, dtype=np.float64)
    src = (i + 0.5) * scale - 0.5
    src = np.maximum(src, 0.0)                        # PyTorch clamps negative coords to 0
    i0 = np.minimum(np.floor(src).astype(np.int64), in_size - 1)
    i1 = np.minimum(i0 + 1, in_size - 1)
    w1 = (src - i0).astype(np.float64)
    w0 = 1.0 - w1
    A = np.zeros((out_size, in_size), dtype=np.float32)
    A[np.arange(out_size), i0] += w0
    A[np.arange(out_size), i1] += w1
    return A


def _padded_bytes(shape, itemsize=4):
    """Rough VMEM footprint of a block (lane-pad to 128, sublane-pad to 8)."""
    s = list(shape)
    if len(s) >= 1:
        s[-1] = -(-s[-1] // 128) * 128
    if len(s) >= 2:
        s[-2] = -(-s[-2] // 8) * 8
    n = 1
    for d in s:
        n *= d
    return n * itemsize


def _vmem_budget_bytes():
    """Per-generation VMEM budget (~80% of capacity: ~51 MiB v7x, ~102 MiB v5e/v6e)."""
    try:
        cap = pltpu.get_tpu_info().vmem_capacity_bytes
    except Exception:
        cap = 64 << 20            # conservative default (v7x-sized)
    return int(cap * 0.8)


def _pick_tile_ho(Hout, H, W, Ccls, Wout, fixed_bytes, budget, max_tile=512):
    """Largest multiple-of-8 Hout tile whose full footprint (incl. t==0 temporaries) fits."""
    def need_for(t):
        n_tiles = -(-Hout // t)
        hpad = n_tiles * t
        need = (fixed_bytes
                + 2 * _padded_bytes((hpad, H))                 # ah input (double-buffered)
                + _padded_bytes((Ccls, hpad, W))               # yh VMEM scratch
                + 2 * _padded_bytes((1, Ccls, t, Wout))        # output block (double-buffered)
                + _padded_bytes((9 * Ccls, H + 2, W + 2))      # conv temporary (t==0)
                + _padded_bytes((Ccls, hpad, H))               # broadcast ah (t==0)
                + _padded_bytes((Ccls, hpad, W)))              # H-upsample result (t==0)
        return n_tiles, hpad, need

    hi = min(max_tile, -(-Hout // 8) * 8)
    choice = (8,) + need_for(8)
    for t in range(8, hi + 1, 8):
        n_tiles, hpad, need = need_for(t)
        if need <= budget:
            choice = (t, n_tiles, hpad, need)
    return choice


def make_kernel(H, W, Cin, Ccls, Hpad, tile_ho):
    def kernel(xp_ref, wst_ref, bf_ref, ah_ref, awt_ref, o_ref, yh_sc):
        t = pl.program_id(1)

        # ---- once per batch element: fused conv3x3(+folded 1x1) and H-upsample ----
        @pl.when(t == 0)
        def _():
            xp = xp_ref[0]                                            # (Cin, H+2, W+2)
            # single stacked-tap contraction: M = 9*Ccls, K = Cin
            z = lax.dot_general(wst_ref[...], xp, (((1,), (0,)), ((), ())),
                                preferred_element_type=jnp.float32)   # (9*Ccls, H+2, W+2)
            # combine the 9 shifted windows of the (small, Ccls-sized) post-matmul tensor
            y = bf_ref[...] + z[0:Ccls, 0:H, 0:W]
            for k in range(1, 9):
                dy, dx = divmod(k, 3)
                y = y + z[k * Ccls:(k + 1) * Ccls, dy:dy + H, dx:dx + W]   # (Ccls, H, W)
            # H-upsample once per batch (batched dot -> result directly (Ccls, Hpad, W))
            ah_b = jnp.broadcast_to(ah_ref[...][None, :, :], (Ccls, Hpad, H))
            yh_sc[...] = lax.dot_general(ah_b, y, (((2,), (1,)), ((0,), (0,))),
                                         preferred_element_type=jnp.float32)

        # ---- per Hout tile: W-upsample straight into NCHW order (lane-dense stores) ----
        row0 = pl.multiple_of(t * tile_ho, tile_ho)
        slab = yh_sc[:, pl.ds(row0, tile_ho), :]                      # (Ccls, tile_ho, W)
        out = lax.dot_general(slab, awt_ref[...], (((2,), (0,)), ((), ())),
                              preferred_element_type=jnp.float32)     # (Ccls, tile_ho, Wout)
        o_ref[0] = out.astype(o_ref.dtype)
    return kernel


def bisenet_output_forward(x_nchw, params, up_factor):
    N, Cin, H, W = x_nchw.shape
    w3 = params["conv_w"]       # (Cmid, Cin, 3, 3)  torch OIHW
    b3 = params["conv_b"]       # (Cmid,)
    w1 = params["conv_out_w"]   # (Ccls, Cmid, 1, 1)
    b1 = params["conv_out_b"]   # (Ccls,)
    Ccls = w1.shape[0]
    Hout, Wout = H * up_factor, W * up_factor

    # ---- fold the 1x1 conv into the 3x3 conv (exact: no nonlinearity in between) ----
    w1_mat = w1[:, :, 0, 0]                                          # (Ccls, Cmid)
    wf = jnp.einsum('cm,mipq->cipq', w1_mat, w3)                     # (Ccls, Cin, 3, 3)
    wst = jnp.transpose(wf, (2, 3, 0, 1)).reshape(9 * Ccls, Cin)     # tap-stacked (9*Ccls, Cin)
    bf = (w1_mat @ b3 + b1).reshape(Ccls, 1, 1)

    # zero halo for the 3x3 conv (tiny vs. the up_factor^2 output traffic)
    # TODO(synk): handle the halo with in-kernel boundary masks to drop this extra pass over x.
    xpad = jnp.pad(x_nchw, ((0, 0), (0, 0), (1, 1), (1, 1)))

    # ---- per-generation VMEM budget -> Hout tile size (cdiv grid, padded last tile) ----
    budget = _vmem_budget_bytes()
    fixed = 2 * (_padded_bytes((1, Cin, H + 2, W + 2)) + _padded_bytes((9 * Ccls, Cin))
                 + _padded_bytes((Ccls, 1, 1)) + _padded_bytes((W, Wout)))
    tile_ho, n_tiles, hpad, need = _pick_tile_ho(Hout, H, W, Ccls, Wout, fixed, budget)
    vmem_limit = int(min(max(need + (4 << 20), 16 << 20), budget))

    # interpolation matrices (align_corners=False); ah zero-padded to the tile grid,
    # aw passed pre-transposed so its block and the output stores are lane-dense.
    ah_np = np.zeros((hpad, H), dtype=np.float32)
    ah_np[:Hout] = _bilinear_matrix(H, Hout)
    ah = jnp.asarray(ah_np)                                          # (hpad, H)
    awt = jnp.asarray(_bilinear_matrix(W, Wout).T)                   # (W, Wout)

    kernel = make_kernel(H, W, Cin, Ccls, hpad, tile_ho)
    out = pl.pallas_call(
        kernel,
        out_shape=jax.ShapeDtypeStruct((N, Ccls, Hout, Wout), x_nchw.dtype),
        grid=(N, n_tiles),
        in_specs=[
            pl.BlockSpec((1, Cin, H + 2, W + 2), lambda n, t: (n, 0, 0, 0)),
            pl.BlockSpec((9 * Ccls, Cin), lambda n, t: (0, 0)),
            pl.BlockSpec((Ccls, 1, 1), lambda n, t: (0, 0, 0)),
            pl.BlockSpec((hpad, H), lambda n, t: (0, 0)),
            pl.BlockSpec((W, Wout), lambda n, t: (0, 0)),
        ],
        out_specs=pl.BlockSpec((1, Ccls, tile_ho, Wout), lambda n, t: (n, 0, t, 0)),
        scratch_shapes=[pltpu.VMEM((Ccls, hpad, W), jnp.float32)],
        compiler_params=pltpu.CompilerParams(
            dimension_semantics=("parallel", "arbitrary"),
            vmem_limit_bytes=vmem_limit),
    )(xpad, wst, bf, ah, awt)
    return out


if __name__ == "__main__":
    key = jax.random.PRNGKey(0)
    N, Cin, H, W = 2, 4, 16, 16
    Cmid, n_classes, up_factor = 8, 3, 4

    k1, k2, k3, k4, k5 = jax.random.split(key, 5)
    x = jax.random.normal(k1, (N, Cin, H, W), jnp.float32)
    params = {
        "conv_w": jax.random.normal(k2, (Cmid, Cin, 3, 3), jnp.float32) * 0.1,
        "conv_b": jax.random.normal(k3, (Cmid,), jnp.float32) * 0.1,
        "conv_out_w": jax.random.normal(k4, (n_classes, Cmid, 1, 1), jnp.float32) * 0.1,
        "conv_out_b": jax.random.normal(k5, (n_classes,), jnp.float32) * 0.1,
    }

    out = bisenet_output_forward(x, params, up_factor)
    out = jax.block_until_ready(out)
    assert out.shape == (N, n_classes, H * up_factor, W * up_factor)
    assert out.dtype == jnp.float32

    # pure-JAX reference (unfused convs + same interpolation matrices)
    y = lax.conv_general_dilated(x, params["conv_w"], (1, 1), ((1, 1), (1, 1)),
                                 dimension_numbers=("NCHW", "OIHW", "NCHW"))
    y = y + params["conv_b"][None, :, None, None]
    y = lax.conv_general_dilated(y, params["conv_out_w"], (1, 1), ((0, 0), (0, 0)),
                                 dimension_numbers=("NCHW", "OIHW", "NCHW"))
    y = y + params["conv_out_b"][None, :, None, None]
    ah_ref = jnp.asarray(_bilinear_matrix(H, H * up_factor))
    aw_ref = jnp.asarray(_bilinear_matrix(W, W * up_factor))
    ref = jnp.einsum("oh,nchw,pw->ncop", ah_ref, y, aw_ref)
    np.testing.assert_allclose(np.asarray(out), np.asarray(ref), rtol=1e-4, atol=1e-4)

    print("KERNEL_OK")
</pallas_src>

<mosaic_0001>
module attributes {stable_mosaic.version = 11 : i64} {
  func.func @kernel(%arg0: i32, %arg1: i32, %arg2: memref<1x4x18x18xf32, #tpu.memory_space<vmem>>, %arg3: memref<27x4xf32, #tpu.memory_space<vmem>>, %arg4: memref<3x1x1xf32, #tpu.memory_space<vmem>>, %arg5: memref<64x16xf32, #tpu.memory_space<vmem>>, %arg6: memref<16x64xf32, #tpu.memory_space<vmem>>, %arg7: memref<1x3x64x64xf32, #tpu.memory_space<vmem>>, %arg8: memref<3x64x16xf32, #tpu.memory_space<vmem>>) attributes {dimension_semantics = [#tpu.dimension_semantics<parallel>, #tpu.dimension_semantics<arbitrary>], iteration_bounds = array<i64: 2, 1>, scalar_prefetch = 0 : i64, scratch_operands = 1 : i64, tpu.core_type = #tpu.core_type<tc>, window_params = [{transform_indices = @transform_0, window_bounds = array<i64: 1, 4, 18, 18>}, {pipeline_mode = #tpu.pipeline_mode<synchronous>, transform_indices = @transform_1, window_bounds = array<i64: 27, 4>}, {pipeline_mode = #tpu.pipeline_mode<synchronous>, transform_indices = @transform_2, window_bounds = array<i64: 3, 1, 1>}, {pipeline_mode = #tpu.pipeline_mode<synchronous>, transform_indices = @transform_3, window_bounds = array<i64: 64, 16>}, {pipeline_mode = #tpu.pipeline_mode<synchronous>, transform_indices = @transform_4, window_bounds = array<i64: 16, 64>}, {transform_indices = @transform_5, window_bounds = array<i64: 1, 3, 64, 64>}]} {
    %c0_i32 = arith.constant 0 : i32
    %0 = arith.cmpi eq, %arg1, %c0_i32 : i32
    %1 = arith.extui %0 : i1 to i32
    %c0_i32_0 = arith.constant 0 : i32
    %2 = arith.cmpi ne, %1, %c0_i32_0 : i32
    scf.if %2 {
      %c0_8 = arith.constant 0 : index
      %c0_9 = arith.constant 0 : index
      %c0_10 = arith.constant 0 : index
      %c0_11 = arith.constant 0 : index
      %12 = vector.load %arg2[%c0_8, %c0_9, %c0_10, %c0_11] : memref<1x4x18x18xf32, #tpu.memory_space<vmem>>, vector<1x4x18x18xf32>
      %13 = vector.shape_cast %12 : vector<1x4x18x18xf32> to vector<4x18x18xf32>
      %c0_12 = arith.constant 0 : index
      %c0_13 = arith.constant 0 : index
      %14 = vector.load %arg3[%c0_12, %c0_13] : memref<27x4xf32, #tpu.memory_space<vmem>>, vector<27x4xf32>
      %cst_14 = arith.constant dense<0.000000e+00> : vector<27x18x18xf32>
      %15 = tpu.matmul %14, %13, %cst_14 {dimension_numbers = #tpu.dot_dimension_numbers<[1], [0], [0], [1, 2], [0, 0, 1, 1, 1, 2], [], []>} : vector<27x4xf32>, vector<4x18x18xf32>, vector<27x18x18xf32> -> vector<27x18x18xf32>
      %c0_15 = arith.constant 0 : index
      %c0_16 = arith.constant 0 : index
      %c0_17 = arith.constant 0 : index
      %16 = vector.load %arg4[%c0_15, %c0_16, %c0_17] : memref<3x1x1xf32, #tpu.memory_space<vmem>>, vector<3x1x1xf32>
      %17 = vector.extract_strided_slice %15 {offsets = [0, 0, 0], sizes = [3, 16, 16], strides = [1, 1, 1]} : vector<27x18x18xf32> to vector<3x16x16xf32>
      %18 = vector.broadcast %16 : vector<3x1x1xf32> to vector<3x16x16xf32>
      %19 = arith.addf %18, %17 : vector<3x16x16xf32>
      %20 = vector.extract_strided_slice %15 {offsets = [3, 0, 1], sizes = [3, 16, 16], strides = [1, 1, 1]} : vector<27x18x18xf32> to vector<3x16x16xf32>
      %21 = arith.addf %19, %20 : vector<3x16x16xf32>
      %22 = vector.extract_strided_slice %15 {offsets = [6, 0, 2], sizes = [3, 16, 16], strides = [1, 1, 1]} : vector<27x18x18xf32> to vector<3x16x16xf32>
      %23 = arith.addf %21, %22 : vector<3x16x16xf32>
      %24 = vector.extract_strided_slice %15 {offsets = [9, 1, 0], sizes = [3, 16, 16], strides = [1, 1, 1]} : vector<27x18x18xf32> to vector<3x16x16xf32>
      %25 = arith.addf %23, %24 : vector<3x16x16xf32>
      %26 = vector.extract_strided_slice %15 {offsets = [12, 1, 1], sizes = [3, 16, 16], strides = [1, 1, 1]} : vector<27x18x18xf32> to vector<3x16x16xf32>
      %27 = arith.addf %25, %26 : vector<3x16x16xf32>
      %28 = vector.extract_strided_slice %15 {offsets = [15, 1, 2], sizes = [3, 16, 16], strides = [1, 1, 1]} : vector<27x18x18xf32> to vector<3x16x16xf32>
      %29 = arith.addf %27, %28 : vector<3x16x16xf32>
      %30 = vector.extract_strided_slice %15 {offsets = [18, 2, 0], sizes = [3, 16, 16], strides = [1, 1, 1]} : vector<27x18x18xf32> to vector<3x16x16xf32>
      %31 = arith.addf %29, %30 : vector<3x16x16xf32>
      %32 = vector.extract_strided_slice %15 {offsets = [21, 2, 1], sizes = [3, 16, 16], strides = [1, 1, 1]} : vector<27x18x18xf32> to vector<3x16x16xf32>
      %33 = arith.addf %31, %32 : vector<3x16x16xf32>
      %34 = vector.extract_strided_slice %15 {offsets = [24, 2, 2], sizes = [3, 16, 16], strides = [1, 1, 1]} : vector<27x18x18xf32> to vector<3x16x16xf32>
      %35 = arith.addf %33, %34 : vector<3x16x16xf32>
      %c0_18 = arith.constant 0 : index
      %c0_19 = arith.constant 0 : index
      %36 = vector.load %arg5[%c0_18, %c0_19] : memref<64x16xf32, #tpu.memory_space<vmem>>, vector<64x16xf32>
      %37 = vector.shape_cast %36 : vector<64x16xf32> to vector<1x64x16xf32>
      %38 = vector.shape_cast %37 : vector<1x64x16xf32> to vector<1x64x16xf32>
      %39 = vector.broadcast %38 : vector<1x64x16xf32> to vector<3x64x16xf32>
      %cst_20 = arith.constant dense<0.000000e+00> : vector<3x64x16xf32>
      %40 = tpu.matmul %39, %35, %cst_20 {dimension_numbers = #tpu.dot_dimension_numbers<[2], [1], [1], [2], [0, 0, 0, 1, 1, 2], [0], [0]>} : vector<3x64x16xf32>, vector<3x16x16xf32>, vector<3x64x16xf32> -> vector<3x64x16xf32>
      %c0_21 = arith.constant 0 : index
      %c0_22 = arith.constant 0 : index
      %c0_23 = arith.constant 0 : index
      %41 = vector.load %arg8[%c0_21, %c0_22, %c0_23] : memref<3x64x16xf32, #tpu.memory_space<vmem>>, vector<3x64x16xf32>
      tpu.vector_store %arg8[%c0_21, %c0_22, %c0_23], %40 {strides = array<i32>} : memref<3x64x16xf32, #tpu.memory_space<vmem>>, vector<3x64x16xf32>,
    } else {
    }
    %c64_i32 = arith.constant 64 : i32
    %3 = arith.muli %arg1, %c64_i32 : i32
    %4 = tpu.assume_multiple %3, 64 : i32
    %c0 = arith.constant 0 : index
    %5 = arith.index_cast %4 : i32 to index
    %c0_1 = arith.constant 0 : index
    %6 = vector.load %arg8[%c0, %5, %c0_1] : memref<3x64x16xf32, #tpu.memory_space<vmem>>, vector<3x64x16xf32>
    %c0_2 = arith.constant 0 : index
    %c0_3 = arith.constant 0 : index
    %7 = vector.load %arg6[%c0_2, %c0_3] : memref<16x64xf32, #tpu.memory_space<vmem>>, vector<16x64xf32>
    %cst = arith.constant dense<0.000000e+00> : vector<3x64x64xf32>
    %8 = tpu.matmul %6, %7, %cst {dimension_numbers = #tpu.dot_dimension_numbers<[2], [0], [0, 1], [1], [0, 0, 0, 1, 1, 1], [], []>} : vector<3x64x16xf32>, vector<16x64xf32>, vector<3x64x64xf32> -> vector<3x64x64xf32>
    %c0_4 = arith.constant 0 : index
    %c0_5 = arith.constant 0 : index
    %c0_6 = arith.constant 0 : index
    %c0_7 = arith.constant 0 : index
    %9 = vector.load %arg7[%c0_4, %c0_5, %c0_6, %c0_7] : memref<1x3x64x64xf32, #tpu.memory_space<vmem>>, vector<1x3x64x64xf32>
    %10 = vector.shape_cast %9 : vector<1x3x64x64xf32> to vector<3x64x64xf32>
    %11 = vector.shape_cast %8 : vector<3x64x64xf32> to vector<1x3x64x64xf32>
    tpu.vector_store %arg7[%c0_4, %c0_5, %c0_6, %c0_7], %11 {strides = array<i32>} : memref<1x3x64x64xf32, #tpu.memory_space<vmem>>, vector<1x3x64x64xf32>,
    return
  }
  func.func @transform_0(%arg0: i32, %arg1: i32) -> (i32, i32, i32, i32) {
    %c0_i32 = arith.constant 0 : i32
    %c0_i32_0 = arith.constant 0 : i32
    %c0_i32_1 = arith.constant 0 : i32
    %c0_i32_2 = arith.constant 0 : i32
    return %arg0, %c0_i32, %c0_i32_0, %c0_i32_1 : i32, i32, i32, i32
  }
  func.func @transform_1(%arg0: i32, %arg1: i32) -> (i32, i32) {
    %c0_i32 = arith.constant 0 : i32
    %c0_i32_0 = arith.constant 0 : i32
    %c0_i32_1 = arith.constant 0 : i32
    return %c0_i32, %c0_i32_0 : i32, i32
  }
  func.func @transform_2(%arg0: i32, %arg1: i32) -> (i32, i32, i32) {
    %c0_i32 = arith.constant 0 : i32
    %c0_i32_0 = arith.constant 0 : i32
    %c0_i32_1 = arith.constant 0 : i32
    %c0_i32_2 = arith.constant 0 : i32
    return %c0_i32, %c0_i32_0, %c0_i32_1 : i32, i32, i32
  }
  func.func @transform_3(%arg0: i32, %arg1: i32) -> (i32, i32) {
    %c0_i32 = arith.constant 0 : i32
    %c0_i32_0 = arith.constant 0 : i32
    %c0_i32_1 = arith.constant 0 : i32
    return %c0_i32, %c0_i32_0 : i32, i32
  }
  func.func @transform_4(%arg0: i32, %arg1: i32) -> (i32, i32) {
    %c0_i32 = arith.constant 0 : i32
    %c0_i32_0 = arith.constant 0 : i32
    %c0_i32_1 = arith.constant 0 : i32
    return %c0_i32, %c0_i32_0 : i32, i32
  }
  func.func @transform_5(%arg0: i32, %arg1: i32) -> (i32, i32, i32, i32) {
    %c0_i32 = arith.constant 0 : i32
    %c0_i32_0 = arith.constant 0 : i32
    %c0_i32_1 = arith.constant 0 : i32
    return %arg0, %c0_i32, %arg1, %c0_i32_0 : i32, i32, i32, i32
  }
}

</mosaic_0001>

<bundles_post_ra>
// kernel: tpu_custom_call.1
= control target key start
LH: loop header
LB: loop body
LE: loop exit
PB: predicated region body
PF: predicated region fallthrough
CT: control target
= control target key end

     0   :  { %10 = vsyncpa [#allocation4], 0  ;;  %s4793_s0 = inlined_call_operand.vmem [shape: f32[2,4,18,18], index: 0, kind: input, shape index: {}]   ;;  %s4794_s1 = inlined_call_operand.vmem [shape: f32[27,4], index: 1, kind: input, shape index: {}]   ;;  %s4795_s2 = inlined_call_operand.vmem [shape: f32[3,1,1], index: 2, kind: input, shape index: {}]   ;;  %s4796_s3 = inlined_call_operand.vmem [shape: f32[64,16], index: 3, kind: input, shape index: {}]   ;;  %s4797_s4 = inlined_call_operand.vmem [shape: f32[16,64], index: 4, kind: input, shape index: {}]   ;;  %s4798_s5 = inlined_call_operand.hbm [shape: f32[2,3,64,64], index: 5, kind: output, shape index: {}]  }
   0x1   :  { %12 = vsyncpa [#allocation4 + $0x1], 0  ;;  %s3066_s18 = smov 0   ;;  %s3068_s19 = smov 0  }
   0x2   :  { %s3070_s20 = smov 0   ;;  %s3072_s21 = smov 0  }
   0x3   :  { %s3074_s22 = smov 0   ;;  %s3076_s23 = smov 0  }
   0x4 LB: > { %s2709_s24 = sadd.s32 4294967295, %s2993_s23   ;;  %s2710_s25 = sadd.s32 4294967294, %s2993_s23   ;;  %s2993_s23 = sphi %s3076_s23, %s18_s23   ;;  %s2989_s22 = sphi %s3074_s22, %s5108_s22   ;;  %s2985_s21 = sphi %s3072_s21, %s5107_s21   ;;  %s2981_s20 = sphi %s3070_s20, %s5106_s20   ;;  %s2977_s19 = sphi %s3068_s19, %s5105_s19   ;;  %s2973_s18 = sphi %s3066_s18, %s5104_s18  }
   0x5   : > { %s30_s26 = sadd.s32 1, %s2989_s22  ;;  %s149_s27 = sadd.s32 1, %s2981_s20 }
   0x6   : > { %p32_p0 = scmp.ge.s32.totalorder %s30_s26, 2  ;;  %p159_p1 = scmp.ne.s32.totalorder %s2981_s20, %s2977_s19 }
   0x7   : > { %p160_p2 = scmp.eq.s32.totalorder %s2709_s24, 1  ;;  %p165_p3 = scmp.ne.s32.totalorder %s2977_s19, %s2973_s18 }
   0x8   : > { %s5110_s26 = smov (%p32_p0, %s30_s26), 0  ;;  %p166_p5 = scmp.eq.s32.totalorder %s2710_s25, 1 }
   0x9   : > { %p3106_p4 = por %p160_p2, %p159_p1  ;;  %s144_s29 = ssub.s32 %s2989_s22, %s5110_s26 }
   0xa   : > { %p2713_p6 = scmp.ge.s32.totalorder %s2993_s23, 1  ;;  %p147_p7 = scmp.eq.s32.totalorder %s144_s29, 0 }
   0xb   : > { %p3113_p8 = por %p166_p5, %p165_p3  ;;  %p204_p9 = scmp.lt.s32.totalorder %s2993_s23, 3 }
   0xc   : > { %s3119_s6 = scalar_select %p147_p7, %s2981_s20, %s149_s27  }
   0xd   : > { %p205_p10 = pnand %p2713_p6, %p204_p9 }
   0xf   : > { %208 = sbr.rel (%p205_p10) target bundleno = 1187 (0x4a3), region = 40 }
  0x14   : > { %p232_p11 = scmp.lt.s32.totalorder %s2985_s21, 1  ;;  %v2995_v0 = vmov 1983009808   ;;  %vm4801_vm0 = vcmask 1047556   ;;  %v2996_v10 = vmov 1934713408  }
  0x15   : > { %v264_v1 = vunpack.c.l.s4 %v2995_v0  ;;  %v288_v11 = vunpack.c.l.s4 %v2996_v10  ;;  %s2997_s12 = smov 72   ;;  %s2998_s13 = smov 36   ;;  %vm459_vm1 = vcmask 146432   ;;  %vm461_vm2 = vcmask 293888  }
  0x16   : > { %s233_s7 = scalar_select %p232_p11, %s2985_s21, 1  ;;  %vm463_vm3 = vcmask 441344   ;;  %vm465_vm4 = vcmask 588800   ;;  %vm467_vm5 = vcmask 736256   ;;  %vm469_vm6 = vcmask 883712  }
  0x17   : > { %v3131_v5 = vunpack.c.0.s8 %v264_v1  ;;  %v3150_v26 = vunpack.c.0.s8 %v288_v11  ;;  %s2999_s14 = smov 108   ;;  %s3000_s15 = smov 124   ;;  %vm471_vm7 = vcmask 1031168   ;;  %vm631_vm8 = vcmask 1043456  }
  0x18   : > { %s2787_s8 = smul.u32 96, %s233_s7  ;;  %s3001_s16 = smov 18   ;;  %vm618_vm9 = vcmask 31744   ;;  %vm4804_vm10 = vcmask 113664   ;;  %vm4803_vm11 = vcmask 261120   ;;  %vm4802_vm12 = vcmask 408576  }
  0x19   : > { %s3002_s17 = smov 90   ;;  %s3003_s24 = smov 54   ;;  %vm473_vm13 = vcmask 130048   ;;  %vm475_vm14 = vcmask 277504   ;;  %vm477_vm15 = vcmask 424960  }
  0x1a   : > { %s3126_s11 = scalar_lea.vmem %s4793_s0, %s2787_s8  ;;  %s3004_s25 = smov 126  }
  0x1b   : > { %v242_v2 = vld [vmem:[%s3126_s11] sm:$0xff]  ;;  %v245_v3 = vld [vmem:[%s3126_s11 + $0x18] sm:$0xff]  ;;  %v248_v4 = vld [vmem:[%s3126_s11 + $0x30] sm:$0xff]  ;;  %s3005_s27 = smov 14   ;;  %s4800_s29 = smov 32  }
  0x1c   : > { %v251_v6 = vld [vmem:[%s3126_s11 + $0x48] sm:$0xff]  ;;  %v258_v7 = vrot.slane %v248_v4, 4  ;;  %v261_v8 = vrot.slane %v242_v2, 4  ;;  %v273_v9 = vrot.slane %v245_v3, 4  ;;  %v246_v13 = vld [vmem:[%s3126_s11 + $0x20] sm:$0xff]  ;;  %v3139_v15 = vld [vmem:[%s3126_s11 + $0x38] sm:$0xff] }
  0x1d   : > { %v3135_v12 = vld [vmem:[%s3126_s11 + $0x8] sm:$0xff]  ;;  %v271_v14 = vrot.slane %v251_v6, 4  ;;  %v252_v16 = vld [vmem:[%s3126_s11 + $0x50] sm:$0xff]  ;;  %v329_v18 = vrot.slane %v246_v13, 4  ;;  %v253_v30 = vld [vmem:[%s3126_s11 + $0x58] sm:$0x3] }
  0x1e   : > { %v317_v17 = vrot.slane %v3135_v12, 4  ;;  %v262_v19 = vsel %vm4801_vm0, %v248_v4, %v261_v8  ;;  %v274_v20 = vsel %vm4801_vm0, %v251_v6, %v273_v9  ;;  %v260_v21 = vsel %vm4801_vm0, %v258_v7, %v242_v2  ;;  %v250_v37 = vld [vmem:[%s3126_s11 + $0x40] sm:$0x3]  ;;  %v247_v46 = vld [vmem:[%s3126_s11 + $0x28] sm:$0x3]  ;;  %s4799_s7 = smov 50  }
  0x1f   : > { %v270_v22 = vperm.slane %v262_v19, %v3131_v5  ;;  %v282_v23 = vperm.slane %v274_v20, %v3131_v5  ;;  %v266_v24 = vperm.slane %v260_v21, %v3131_v5  ;;  %v272_v25 = vsel %vm4801_vm0, %v271_v14, %v245_v3  ;;  %v244_v50 = vld [vmem:[%s3126_s11 + $0x10] sm:$0x3]  ;;  %s3009_s8 = smov 16   ;;  %s3010_s9 = smov 34  }
  0x20   : > { %v278_v27 = vperm.slane %v272_v25, %v3131_v5  ;;  %v318_v28 = vsel %vm4801_vm0, %v3139_v15, %v317_v17  ;;  %v330_v29 = vsel %vm4801_vm0, %v252_v16, %v329_v18  ;;  %v377_v41 = vrot.slane %v253_v30, 4  ;;  %s3011_s10 = smov 52   ;;  %s3012_s11 = smov 70  }
  0x21   : > { %v295_v31 = vrot.slane %v282_v23, 4  ;;  %v285_v32 = vrot.slane %v266_v24, 4  ;;  %v3158_v33 = vperm.slane %v318_v28, %v3131_v5  ;;  %v3161_v35 = vperm.slane %v330_v29, %v3131_v5 }
  0x22   : > { %v283_v34 = vrot.slane %v278_v27, 4  ;;  %v297_v36 = vrot.slane %v270_v22, 4  ;;  %v371_v49 = vrot.slane %v250_v37, 4  ;;  %v378_v53 = vsel %vm4801_vm0, %v377_v41, %v247_v46 }
  0x23   : > { %v296_v38 = vsel %vm4801_vm0, %v295_v31, %v270_v22  ;;  %v286_v39 = vsel %vm4801_vm0, %v278_v27, %v285_v32  ;;  %v353_v40 = vrot.slane %v3158_v33, 4  ;;  %v382_v55 = vperm.slane %v378_v53, %v3131_v5 }
  0x24   : > { %v302_v42 = vperm.slane %v296_v38, %v3150_v26  ;;  %v294_v43 = vperm.slane %v286_v39, %v3150_v26  ;;  %v284_v44 = vsel %vm4801_vm0, %v283_v34, %v266_v24  ;;  %v298_v45 = vsel %vm4801_vm0, %v282_v23, %v297_v36 }
  0x25   : > { %v3173_v47 = vperm.slane %v284_v44, %v3150_v26  ;;  %v306_v48 = vperm.slane %v298_v45, %v3150_v26  ;;  %v354_v51 = vsel %vm4801_vm0, %v3161_v35, %v353_v40  ;;  %v327_v56 = vrot.slane %v252_v16, 4 }
  0x26   : > { %404 = vrot.lane.b32.xlu1 %v302_v42, %s2997_s12  ;;  %396 = vrot.lane.b32.xlu0 %v294_v43, %s2998_s13  ;;  %v311_v54 = vrot.slane %v302_v42, 4  ;;  %v372_v57 = vsel %vm4801_vm0, %v371_v49, %v244_v50  ;;  %v362_v58 = vperm.slane %v354_v51, %v3150_v26  ;;  %v383_v62 = vrot.slane %v382_v55, 4 }
  0x27   : > { %v307_v52 = vrot.slane %v3173_v47, 4  ;;  %412 = vrot.lane.b32.xlu2 %v306_v48, %s2999_s14  ;;  %v376_v61 = vperm.slane %v372_v57, %v3131_v5  ;;  %v315_v63 = vrot.slane %v3139_v15, 4  ;;  %v328_v0 = vsel %vm4801_vm0, %v327_v56, %v246_v13 }
  0x28   : > { %v312_v60 = vsel %vm4801_vm0, 0.0, %v311_v54  ;;  %v309_v1 = vrot.slane %v294_v43, 4  ;;  %v313_v2 = vrot.slane %v306_v48, 4  ;;  %v369_v4 = vrot.slane %v362_v58, 4 }
  0x29   : > { %v308_v59 = vsel %vm4801_vm0, 0.0, %v307_v52  ;;  %v384_v3 = vsel %vm4801_vm0, %v383_v62, %v376_v61  ;;  %v334_v6 = vperm.slane %v328_v0, %v3131_v5  ;;  %v316_v7 = vsel %vm4801_vm0, %v315_v63, %v3135_v12  ;;  %v254_v61 = vld [vmem:[%s4794_s1] sm:$0xff]  ;;  %v255_v62 = vld [vmem:[%s4794_s1 + $0x8] sm:$0xff] }
  0x2a   : > { %v310_v8 = vsel %vm4801_vm0, 0.0, %v309_v1  ;;  %v314_v9 = vsel %vm4801_vm0, 0.0, %v313_v2  ;;  %v388_v10 = vperm.slane %v384_v3, %v3150_v26  ;;  %v370_v11 = vsel %vm4801_vm0, 0.0, %v369_v4 }
  0x2b   : > { %v322_v13 = vperm.slane %v316_v7, %v3131_v5  ;;  %v339_v14 = vrot.slane %v334_v6, 4  ;;  %v351_v20 = vrot.slane %v3161_v35, 4  ;;  %v3006_v21 = vmov 0.0   ;;  %v256_v7 = vld [vmem:[%s4794_s1 + $0x10] sm:$0xff] }
  0x2c   : > { %v389_v15 = vrot.slane %v388_v10, 4  ;;  %v497_v22 = vperm.slane %v3006_v21, %v3131_v5 }
  0x2d   : > { %v341_v12 = vrot.slane %v322_v13, 4  ;;  %v340_v16 = vsel %vm4801_vm0, %v339_v14, %v322_v13  ;;  %v352_v25 = vsel %vm4801_vm0, %v351_v20, %v3158_v33  ;;  %v257_v14 = vld [vmem:[%s4794_s1 + $0x18] sm:$0x7] }
  0x2e   : > { %444 = vrot.lane.b32.xlu1 %v362_v58, %s3000_s15  ;;  %392 = vrot.lane.b32.xlu0 %v308_v59, %s3001_s16  ;;  %v390_v17 = vsel %vm4801_vm0, 0.0, %v389_v15  ;;  %v346_v18 = vperm.slane %v340_v16, %v3150_v26  ;;  %v498_v28 = vrot.slane %v497_v22, 4  ;;  %v358_v30 = vperm.slane %v352_v25, %v3150_v26 }
  0x2f   : > { %408 = vrot.lane.b32.xlu2 %v312_v60, %s3002_s17  ;;  %v342_v19 = vsel %vm4801_vm0, %v334_v6, %v341_v12  ;;  %v507_v34 = vsel %vm4801_vm0, 0.0, %v497_v22 }
  0x30   : > { %v350_v23 = vperm.slane %v342_v19, %v3150_v26  ;;  %v363_v24 = vrot.slane %v346_v18, 4  ;;  %v499_v32 = vsel %vm4801_vm0, %v498_v28, %v497_v22  ;;  %v367_v35 = vrot.slane %v358_v30, 4 }
  0x31   : > { %v503_v33 = vperm.slane %v499_v32, %v3150_v26  ;;  %v3226_v36 = vperm.slane %v507_v34, %v3150_v26 }
  0x32   : > { %v365_v27 = vrot.slane %v350_v23, 4  ;;  %v364_v29 = vsel %vm4801_vm0, 0.0, %v363_v24  ;;  %v368_v37 = vsel %vm4801_vm0, 0.0, %v367_v35 }
  0x33   : > { %v504_v38 = vrot.slane %v503_v33, 4  ;;  %v512_v39 = vrot.slane %v3226_v36, 4 }
  0x34   : > { %v366_v31 = vsel %vm4801_vm0, 0.0, %v365_v27 }
  0x35   : > { %v3231_v40 = vsel %vm4801_vm0, %v504_v38, %v503_v33  ;;  %v506_v41 = vsel %vm4801_vm0, %v503_v33, %v504_v38  ;;  %v513_v42 = vsel %vm4801_vm0, 0.0, %v512_v39  ;;  %vm479_vm0 = vcmask 572416  }
  0x36   : > { %400 = vrot.lane.b32.xlu1 %v310_v8, %s3003_s24  ;;  %416 = vrot.lane.b32.xlu0 %v314_v9, %s3004_s25  ;;  %v2885_v43 = vpack.i.bf16 %v3226_v36, %v3231_v40  ;;  %v2890_v44 = vpack.i.bf16 %v513_v42, %v506_v41 }
  0x37   : > { %448 = vrot.lane.b32.xlu2 %v370_v11, %s3005_s27 }
  0x3e   : > { %452 = vrot.lane.b32.xlu0 %v388_v10, %s4800_s29  ;;  %456 = vrot.lane.b32.xlu1 %v390_v17, %s4799_s7  ;;  %s3013_s7 = smov 88   ;;  %s3014_s29 = smov 106  }
  0x3f   : > { %420 = vrot.lane.b32.xlu2 %v346_v18, %s3009_s8 }
  0x46   : > { %424 = vrot.lane.b32.xlu0 %v364_v29, %s3010_s9  ;;  %428 = vrot.lane.b32.xlu1 %v350_v23, %s3011_s10 }
  0x47   : > { %432 = vrot.lane.b32.xlu2 %v366_v31, %s3012_s11 }
  0x4e   : > { %436 = vrot.lane.b32.xlu0 %v358_v30, %s3013_s7  ;;  %440 = vrot.lane.b32.xlu1 %v368_v37, %s3014_s29 }
  0x4f   : > { %538 = vrot.lane.b32.xlu2 %v3006_v21, %s3004_s25 }
  0x56   : > { %2886 = vrot.lane.b32.xlu0 %v2885_v43, %s3009_s8  ;;  %2891 = vrot.lane.b32.xlu1 %v2890_v44, %s3010_s9  ;;  %s4828_s8 = smov 50   ;;  %s3016_s9 = smov 74  }
  0x57   : > { %2896 = vrot.lane.b32.xlu2 %v2890_v44, %s3001_s16  ;;  %s4827_s16 = smov 32  }
  0x5e   : > { %555 = vrot.lane.b32.xlu0 %v3006_v21, %s3011_s10  ;;  %523 = vrot.lane.b32.xlu1 %v3006_v21, %s2998_s13  ;;  %s3017_s10 = smov 92   ;;  %s3022_s13 = smov 114  }
  0x5f   : > { %558 = vrot.lane.b32.xlu2 %v3006_v21, %s3012_s11  ;;  %s3018_s11 = smov 110  }
  0x66   : > { %526 = vrot.lane.b32.xlu0 %v3006_v21, %s3003_s24  ;;  %561 = vrot.lane.b32.xlu1 %v3006_v21, %s3013_s7  ;;  %s3015_s7 = smov 20   ;;  %s3026_s24 = smov 58  }
  0x67   : > { %529 = vrot.lane.b32.xlu2 %v3006_v21, %s2997_s12  ;;  %s3021_s12 = smov 2  }
  0x6e   : > { %564 = vrot.lane.b32.xlu0 %v3006_v21, %s3014_s29  ;;  %567 = vrot.lane.b32.xlu1 %v3006_v21, %s3000_s15  ;;  %s3024_s15 = smov 96   ;;  %s3028_s29 = smov 76  }
  0x6f   : > { %570 = vrot.lane.b32.xlu2 %v3006_v21, %s3005_s27  ;;  %s3027_s27 = smov 94  }
  0x76   : > { %532 = vrot.lane.b32.xlu0 %v3006_v21, %s3002_s17  ;;  %2901 = vrot.lane.b32.xlu1 %v2885_v43, %s4827_s16  ;;  %s3019_s16 = smov 38   ;;  %s3025_s17 = smov 78  }
  0x77   : > { %535 = vrot.lane.b32.xlu2 %v3006_v21, %s2999_s14  ;;  %s3023_s14 = smov 4  }
  0x7e   : > { %2906 = vrot.lane.b32.xlu0 %v2890_v44, %s4828_s8  ;;  %s3020_s8 = smov 56  }
  0x81   : > { %v413_v45 = vpop.permute.xlu2 %412 }
  0x89   : > { %v409_v46 = vpop.permute.xlu2 %408 }
  0x91   : > { %v449_v50 = vpop.permute.xlu2 %448 }
  0x98   : > { %v405_v48 = vpop.permute.xlu1 %404  ;;  %v397_v49 = vpop.permute.xlu0 %396 }
  0x99   : > { %v421_v54 = vpop.permute.xlu2 %420 }
  0xa0   : > { %v3249_v51 = vpop.permute.xlu1 %444  ;;  %v393_v52 = vpop.permute.xlu0 %392 }
  0xa1   : > { %v460_v53 = vsel %vm459_vm1, %v3173_v47, %v393_v52  ;;  %v433_v0 = vpop.permute.xlu2 %432  ;;  %v488_v1 = vsel %vm4804_vm10, %v3249_v51, %v449_v50  ;;  %vm485_vm10 = vcmask 1014784  }
  0xa2   : > { %v462_v56 = vsel %vm461_vm2, %v460_v53, %v397_v49 }
  0xa8   : > { %v401_v55 = vpop.permute.xlu1 %400  ;;  %v417_v57 = vpop.permute.xlu0 %416 }
  0xa9   : > { %v464_v58 = vsel %vm463_vm3, %v462_v56, %v401_v55  ;;  %v3279_v8 = vpop.permute.xlu2 %538  ;;  %v474_v11 = vsel %vm473_vm13, %v417_v57, %v421_v54 }
  0xaa   : > { %v466_v59 = vsel %vm465_vm4, %v464_v58, %v405_v48 }
  0xab   : > { %v468_v60 = vsel %vm467_vm5, %v466_v59, %v409_v46 }
  0xac   : > { %v470_v47 = vsel %vm469_vm6, %v468_v60, %v413_v45 }
  0xad   : > { %v472_v63 = vsel %vm471_vm7, %v470_v47, %v417_v57 }
  0xae   : > { %2715 = vmatpush.msk.msra.mxu0 %vm631_vm8, %v472_v63  ;;  %2781 = vmatpush.msk.msra.mxu1 %vm631_vm8, %v472_v63 }
  0xaf   : > { %2716 = vmatmul.msk.f32.vlgmr.msra.gmra.mxu0 %vm618_vm9, %v254_v61  ;;  %2717 = vmatmul.msk.f32.vlgmr.msra.gmra.mxu1 %vm618_vm9, %v255_v62 }
  0xb0   : > { %v453_v2 = vpop.permute.xlu0 %452  ;;  %v457_v3 = vpop.permute.xlu1 %456 }
  0xb1   : > { %v490_v4 = vsel %vm4803_vm11, %v488_v1, %v453_v2  ;;  %vm483_vm11 = vcmask 867328   ;;  %v2897_v12 = vpop.permute.xlu2 %2896 }
  0xb2   : > { %v492_v6 = vsel %vm4802_vm12, %v490_v4, %v457_v3  ;;  %vm481_vm12 = vcmask 719872   ;;  %v2899_v19 = vunpack.i.h.bf16 %v2897_v12  ;;  %v2898_v32 = vunpack.i.l.bf16 %v2897_v12 }
  0xb3   : > { %2725 = vmatpush.msk.msra.mxu2 %vm631_vm8, %v492_v6 }
  0xb4   : > { %2726 = vmatmul.msk.f32.vlgmr.msra.gmra.mxu2 %vm618_vm9, %v254_v61  ;;  %v586_v22 = vsel %vm459_vm1, %v3226_v36, %v2899_v19  ;;  %v585_v37 = vsel %vm459_vm1, %v3231_v40, %v2898_v32  ;;  %vm4830_vm1 = vcmask 261120  }
  0xb7   : > { %2718 = vmatmul.msk.f32.gmra.mxu1 %vm618_vm9, %v256_v7 }
  0xb8   : > { %v425_v9 = vpop.permute.xlu0 %424  ;;  %v429_v10 = vpop.permute.xlu1 %428 }
  0xb9   : > { %v476_v13 = vsel %vm475_vm14, %v474_v11, %v425_v9  ;;  %v559_v29 = vpop.permute.xlu2 %558 }
  0xba   : > { %v478_v15 = vsel %vm477_vm15, %v476_v13, %v429_v10 }
  0xbb   : > { %v480_v16 = vsel %vm479_vm0, %v478_v15, %v433_v0 }
  0xbc   : > { %2727 = vmatmul.msk.f32.gmra.mxu2 %vm618_vm9, %v255_v62 }
  0xbf   : > { %2719 = vmatmul.msk.f32.gmra.mxu1 %vm618_vm9, %v257_v14 }
  0xc0   : > { %v437_v17 = vpop.permute.xlu0 %436  ;;  %v441_v18 = vpop.permute.xlu1 %440 }
  0xc1   : > { %v482_v20 = vsel %vm481_vm12, %v480_v16, %v437_v17  ;;  %v530_v48 = vpop.permute.xlu2 %529 }
  0xc2   : > { %v484_v21 = vsel %vm483_vm11, %v482_v20, %v441_v18 }
  0xc3   : > { %v486_v23 = vsel %vm485_vm10, %v484_v21, %v3249_v51 }
  0xc4   : > { %2720 = vmatpush.msk.msrb.mxu1 %vm631_vm8, %v486_v23  ;;  %2728 = vmatmul.msk.f32.gmra.mxu2 %vm618_vm9, %v256_v7 }
  0xc7   : > { %2721 = vmatmul.msk.f32.vlgmr.msrb.gmra.mxu1 %vm618_vm9, %v254_v61 }
  0xc8   : > { %v2887_v24 = vpop.permute.xlu0 %2886  ;;  %v2892_v25 = vpop.permute.xlu1 %2891 }
  0xc9   : > { %v2889_v27 = vunpack.i.h.bf16 %v2887_v24  ;;  %v2888_v28 = vunpack.i.l.bf16 %v2887_v24  ;;  %v2894_v30 = vunpack.i.h.bf16 %v2892_v25  ;;  %v2893_v31 = vunpack.i.l.bf16 %v2892_v25  ;;  %v571_v56 = vpop.permute.xlu2 %570 }
  0xcb   : > { %v600_v34 = vsel %vm473_vm13, %v3279_v8, %v2889_v27  ;;  %v599_v35 = vsel %vm473_vm13, %v3279_v8, %v2888_v28 }
  0xcc   : > { %2729 = vmatmul.msk.f32.gmra.mxu2 %vm618_vm9, %v257_v14  ;;  %v601_v33 = vsel %vm475_vm14, %v599_v35, %v2893_v31  ;;  %v602_v36 = vsel %vm475_vm14, %v600_v34, %v2894_v30 }
  0xcf   : > { %2722 = vmatmul.msk.f32.gmra.mxu1 %vm618_vm9, %v255_v62 }
  0xd0   : > { %v556_v38 = vpop.permute.xlu0 %555  ;;  %v524_v39 = vpop.permute.xlu1 %523 }
  0xd1   : > { %v587_v41 = vsel %vm461_vm2, %v585_v37, %v524_v39  ;;  %v588_v42 = vsel %vm461_vm2, %v586_v22, %v524_v39  ;;  %v603_v43 = vsel %vm477_vm15, %v601_v33, %v556_v38  ;;  %v604_v44 = vsel %vm477_vm15, %v602_v36, %v556_v38  ;;  %v536_v59 = vpop.permute.xlu2 %535 }
  0xd2   : > { %v605_v45 = vsel %vm479_vm0, %v603_v43, %v559_v29  ;;  %v606_v46 = vsel %vm479_vm0, %v604_v44, %v559_v29  ;;  %vm4829_vm0 = vcmask 113664   ;;  %vm4831_vm2 = vcmask 408576  }
  0xd7   : > { %2723 = vmatmul.msk.f32.gmra.mxu1 %vm618_vm9, %v256_v7 }
  0xd8   : > { %v527_v40 = vpop.permute.xlu0 %526  ;;  %v562_v49 = vpop.permute.xlu1 %561 }
  0xd9   : > { %v589_v50 = vsel %vm463_vm3, %v587_v41, %v527_v40  ;;  %v590_v51 = vsel %vm463_vm3, %v588_v42, %v527_v40  ;;  %v607_v52 = vsel %vm481_vm12, %v605_v45, %v562_v49  ;;  %v608_v53 = vsel %vm481_vm12, %v606_v46, %v562_v49  ;;  %vm4832_vm3 = vmmov %vm4830_vm1 }
  0xda   : > { %v591_v54 = vsel %vm465_vm4, %v589_v50, %v530_v48  ;;  %v592_v55 = vsel %vm465_vm4, %v590_v51, %v530_v48  ;;  %vm4833_vm4 = vmmov %vm4831_vm2 }
  0xdf   : > { %2724 = vmatmul.msk.f32.gmra.mxu1 %vm618_vm9, %v257_v14 }
  0xe0   : > { %v565_v57 = vpop.permute.xlu0 %564  ;;  %v568_v60 = vpop.permute.xlu1 %567 }
  0xe1   : > { %v609_v58 = vsel %vm483_vm11, %v607_v52, %v565_v57  ;;  %v610_v63 = vsel %vm483_vm11, %v608_v53, %v565_v57  ;;  %v3361_v15 = vsel %vm4829_vm0, %v568_v60, %v571_v56 }
  0xe2   : > { %v3330_v2 = vsel %vm485_vm10, %v609_v58, %v568_v60  ;;  %v3333_v3 = vsel %vm485_vm10, %v610_v63, %v568_v60 }
  0xe8   : > { %v533_v47 = vpop.permute.xlu0 %532 }
  0xe9   : > { %v593_v61 = vsel %vm467_vm5, %v591_v54, %v533_v47  ;;  %v594_v62 = vsel %vm467_vm5, %v592_v55, %v533_v47  ;;  %vm4834_vm5 = vcmask 1047556  }
  0xea   : > { %v595_v0 = vsel %vm469_vm6, %v593_v61, %v536_v59  ;;  %v596_v1 = vsel %vm469_vm6, %v594_v62, %v536_v59  ;;  %vm4835_vm6 = vmmov %vm4834_vm5 }
  0xeb   : > { %v597_v4 = vsel %vm471_vm7, %v595_v0, %v3279_v8  ;;  %v598_v6 = vsel %vm471_vm7, %v596_v1, %v3279_v8  ;;  %v3355_v8 = vpop.permute.xlu1 %2901  ;;  %vm4836_vm7 = vmmov %vm4834_vm5 }
  0xec   : > { %v2903_v13 = vunpack.i.l.bf16 %v3355_v8  ;;  %v2904_v34 = vunpack.i.h.bf16 %v3355_v8  ;;  %vm4837_vm8 = vmmov %vm4834_vm5 }
  0xed   : > { %vm4838_vm10 = vmmov %vm4834_vm5 }
  0xee   : > { %v614_v16 = vsel %vm4830_vm1, %v3361_v15, %v2903_v13  ;;  %v615_v33 = vsel %vm4832_vm3, %v3361_v15, %v2904_v34  ;;  %vm4839_vm11 = vmmov %vm4834_vm5 }
  0xef   : > { %vm4840_vm12 = vmmov %vm4834_vm5 }
  0xf0   : > { %v3358_v14 = vpop.permute.xlu0 %2906  ;;  %vm4841_vm14 = vmmov %vm4834_vm5 }
  0xf1   : > { %v2908_v12 = vunpack.i.l.bf16 %v3358_v14  ;;  %v2909_v35 = vunpack.i.h.bf16 %v3358_v14  ;;  %vm4842_vm15 = vmmov %vm4834_vm5 }
  0xf2   : > { %vm4843_vm0 = vmmov %vm4834_vm5 }
  0xf3   : > { %v616_v18 = vsel %vm4831_vm2, %v614_v16, %v2908_v12  ;;  %v617_v38 = vsel %vm4833_vm4, %v615_v33, %v2909_v35  ;;  %vm4844_vm1 = vmmov %vm4843_vm0 }
  0xf4   : > { %vm4845_vm2 = vmmov %vm4843_vm0 }
  0xf5   : > { %vm4846_vm3 = vmmov %vm4843_vm0 }
  0xf6   : > { %vm4847_vm4 = vmmov %vm4843_vm0 }
 0x12c   : > { %v658_v7 = vpop.f32.mrf.mxu0  ;;  %v661_v10 = vpop.f32.mrf.mxu1 }
 0x12d   : > { %v3339_v9 = vadd.f32 %v658_v7, %v597_v4  ;;  %v3347_v11 = vadd.f32 %v661_v10, %v597_v4 }
 0x12f   : > { %792 = vrot.lane.b32.xlu2 %v3339_v9, %s3015_s7  ;;  %756 = vrot.lane.b32.xlu0 %v3339_v9, %s3016_s9  ;;  %v963_v42 = vrot.slane %v3339_v9, 4 }
 0x130   : > { %744 = vrot.lane.b32.xlu1 %v3339_v9, %s3017_s10 }
 0x134   : > { %v664_v20 = vpop.f32.mrf.mxu1 }
 0x135   : > { %v3378_v21 = vadd.f32 %v664_v20, %v597_v4 }
 0x137   : > { %732 = vrot.lane.b32.xlu2 %v3339_v9, %s3018_s11  ;;  %782 = vrot.lane.b32.xlu0 %v3347_v11, %s3019_s16  ;;  %v716_v17 = vpop.f32.mrf.mxu2 }
 0x138   : > { %768 = vrot.lane.b32.xlu1 %v3339_v9, %s3020_s8  ;;  %v717_v19 = vadd.f32 %v716_v17, %v616_v18 }
 0x13c   : > { %v667_v24 = vpop.f32.mrf.mxu1 }
 0x13d   : > { %v3405_v25 = vadd.f32 %v667_v24, %v598_v6 }
 0x13f   : > { %758 = vrot.lane.b32.xlu2 %v3347_v11, %s3016_s9  ;;  %780 = vrot.lane.b32.xlu0 %v3339_v9, %s3019_s16  ;;  %v719_v22 = vpop.f32.mrf.mxu2 }
 0x140   : > { %808 = vrot.lane.b32.xlu1 %v3339_v9, %s3021_s12  ;;  %v720_v23 = vadd.f32 %v719_v22, %v616_v18 }
 0x144   : > { %v687_v30 = vpop.f32.mrf.mxu1 }
 0x145   : > { %v688_v31 = vadd.f32 %v687_v30, %v3330_v2 }
 0x147   : > { %734 = vrot.lane.b32.xlu0 %v3347_v11, %s3018_s11  ;;  %933 = vrot.lane.b32.xlu2 %v717_v19, %s3022_s13  ;;  %v722_v27 = vpop.f32.mrf.mxu2 }
 0x148   : > { %812 = vrot.lane.b32.xlu1 %v3347_v11, %s3021_s12  ;;  %v723_v28 = vadd.f32 %v722_v27, %v616_v18 }
 0x14c   : > { %v690_v45 = vpop.f32.mrf.mxu1 }
 0x14d   : > { %v691_v54 = vadd.f32 %v690_v45, %v3330_v2 }
 0x14f   : > { %794 = vrot.lane.b32.xlu0 %v3347_v11, %s3015_s7  ;;  %784 = vrot.lane.b32.xlu2 %v3378_v21, %s3019_s16  ;;  %v725_v37 = vpop.f32.mrf.mxu2 }
 0x150   : > { %770 = vrot.lane.b32.xlu1 %v3347_v11, %s3020_s8  ;;  %v3435_v39 = vadd.f32 %v725_v37, %v617_v38  ;;  %v1187_v38 = vrot.slane %v3347_v11, 4 }
 0x154   : > { %v693_v18 = vpop.f32.mrf.mxu1 }
 0x155   : > { %v694_v24 = vadd.f32 %v693_v18, %v3330_v2 }
 0x157   : > { %816 = vrot.lane.b32.xlu2 %v3378_v21, %s3021_s12  ;;  %911 = vrot.lane.b32.xlu0 %v717_v19, %s3023_s14 }
 0x158   : > { %746 = vrot.lane.b32.xlu1 %v3347_v11, %s3017_s10 }
 0x15f   : > { %772 = vrot.lane.b32.xlu2 %v3378_v21, %s3020_s8  ;;  %736 = vrot.lane.b32.xlu0 %v3378_v21, %s3018_s11 }
 0x160   : > { %760 = vrot.lane.b32.xlu1 %v3378_v21, %s3016_s9 }
 0x167   : > { %796 = vrot.lane.b32.xlu2 %v3378_v21, %s3015_s7  ;;  %748 = vrot.lane.b32.xlu0 %v3378_v21, %s3017_s10 }
 0x168   : > { %945 = vrot.lane.b32.xlu1 %v720_v23, %s3024_s15 }
 0x16f   : > { %953 = vrot.lane.b32.xlu2 %v720_v23, %s3025_s17  ;;  %935 = vrot.lane.b32.xlu0 %v720_v23, %s3022_s13 }
 0x170   : > { %915 = vrot.lane.b32.xlu1 %v720_v23, %s3023_s14 }
 0x177   : > { %738 = vrot.lane.b32.xlu2 %v3405_v25, %s3018_s11  ;;  %820 = vrot.lane.b32.xlu0 %v3405_v25, %s3021_s12  ;;  %s2788_s11 = smul.u32 192, %s2985_s21 }
 0x178   : > { %762 = vrot.lane.b32.xlu1 %v3405_v25, %s3016_s9  ;;  %s3030_s9 = smov 40  }
 0x17f   : > { %955 = vrot.lane.b32.xlu2 %v723_v28, %s3025_s17  ;;  %786 = vrot.lane.b32.xlu0 %v3405_v25, %s3019_s16 }
 0x180   : > { %798 = vrot.lane.b32.xlu1 %v3405_v25, %s3015_s7  ;;  %s3029_s7 = smov 112  }
 0x187   : > { %947 = vrot.lane.b32.xlu2 %v723_v28, %s3024_s15  ;;  %750 = vrot.lane.b32.xlu0 %v3405_v25, %s3017_s10  ;;  %s3031_s10 = smov 22  }
 0x188   : > { %774 = vrot.lane.b32.xlu1 %v3405_v25, %s3020_s8  ;;  %s3033_s8 = smov 127  }
 0x189   : > { %v793_v29 = vpop.permute.xlu2 %792 }
 0x18a   : > { %v985_v63 = vrot.slane %v793_v29, 4 }
 0x18f   : > { %919 = vrot.lane.b32.xlu2 %v723_v28, %s3023_s14  ;;  %869 = vrot.lane.b32.xlu0 %v688_v31, %s3026_s24 }
 0x190   : > { %937 = vrot.lane.b32.xlu1 %v723_v28, %s3022_s13 }
 0x191   : > { %v733_v32 = vpop.permute.xlu2 %732 }
 0x192   : > { %v975_v41 = vrot.slane %v733_v32, 4 }
 0x197   : > { %845 = vrot.lane.b32.xlu0 %v688_v31, %s3027_s27  ;;  %909 = vrot.lane.b32.xlu2 %v688_v31, %s3023_s14 }
 0x198   : > { %857 = vrot.lane.b32.xlu1 %v688_v31, %s3028_s29 }
 0x199   : > { %v759_v36 = vpop.permute.xlu2 %758 }
 0x19a   : > { %v1197_v12 = vrot.slane %v759_v36, 4 }
 0x19f   : > { %923 = vrot.lane.b32.xlu0 %v3435_v39, %s3023_s14  ;;  %833 = vrot.lane.b32.xlu2 %v688_v31, %s3029_s7 }
 0x1a0   : > { %881 = vrot.lane.b32.xlu1 %v688_v31, %s3030_s9 }
 0x1a1   : > { %v757_v43 = vpop.permute.xlu0 %756  ;;  %v3442_v44 = vpop.permute.xlu2 %933 }
 0x1a2   : > { %v745_v46 = vpop.permute.xlu1 %744  ;;  %v973_v48 = vrot.slane %v757_v43, 4  ;;  %v976_v40 = vsel %vm4834_vm5, %v757_v43, %v975_v41  ;;  %vm4848_vm5 = vmmov %vm4843_vm0 }
 0x1a3   : > { %v961_v49 = vrot.slane %v745_v46, 4  ;;  %v964_v50 = vsel %vm4835_vm6, %v745_v46, %v963_v42  ;;  %v984_v51 = vperm.slane %v976_v40, %v3131_v5  ;;  %vm4849_vm6 = vmmov %vm4843_vm0 }
 0x1a4   : > { %v972_v52 = vperm.slane %v964_v50, %v3131_v5  ;;  %v974_v53 = vsel %vm4836_vm7, %v973_v48, %v733_v32  ;;  %vm4850_vm7 = vmmov %vm4843_vm0 }
 0x1a5   : > { %v962_v55 = vsel %vm4837_vm8, %v961_v49, %v3339_v9  ;;  %v980_v56 = vperm.slane %v974_v53, %v3131_v5  ;;  %v1021_v57 = vrot.slane %v984_v51, 4  ;;  %vm4851_vm8 = vmmov %vm4843_vm0 }
 0x1a6   : > { %v968_v58 = vperm.slane %v962_v55, %v3131_v5  ;;  %v1023_v59 = vrot.slane %v972_v52, 4 }
 0x1a7   : > { %v1009_v60 = vrot.slane %v980_v56, 4  ;;  %835 = vrot.lane.b32.xlu0 %v691_v54, %s3029_s7  ;;  %810 = vrot.lane.b32.xlu2 %v688_v31, %s3021_s12  ;;  %v3457_v47 = vsel %vm4838_vm10, %v1021_v57, %v972_v52  ;;  %vm4852_vm10 = vmmov %vm4843_vm0 }
 0x1a8   : > { %v1011_v61 = vrot.slane %v968_v58, 4  ;;  %893 = vrot.lane.b32.xlu1 %v688_v31, %s3031_s10  ;;  %v3461_v62 = vsel %vm4839_vm11, %v984_v51, %v1023_v59  ;;  %vm4853_vm11 = vmmov %vm4843_vm0  ;;  %v696_v59 = vpop.f32.mrf.mxu1 }
 0x1a9   : > { %v3463_v0 = vpop.permute.xlu0 %782  ;;  %v3465_v1 = vpop.permute.xlu2 %784  ;;  %v3468_v4 = vsel %vm4840_vm12, %v1009_v60, %v968_v58  ;;  %vm4854_vm12 = vmmov %vm4843_vm0 }
 0x1aa   : > { %v769_v6 = vpop.permute.xlu1 %768  ;;  %v3471_v7 = vsel %vm4841_vm14, %v980_v56, %v1011_v61  ;;  %v3032_v56 = vmov 0   ;;  %vm4855_vm14 = vmmov %vm4843_vm0 }
 0x1ab   : > { %v3474_v9 = vsel %vm4842_vm15, %v985_v63, %v769_v6  ;;  %v987_v10 = vrot.slane %v769_v6, 4  ;;  %2910 = vset.pattern.permute.xlu0 %v3032_v56  ;;  %2911 = vset.pattern.permute.xlu2 %v3032_v56  ;;  %vm4856_vm15 = vmmov %vm4843_vm0 }
 0x1ad   : > { %v3477_v8 = vsel %vm4843_vm0, %v793_v29, %v987_v10 }
 0x1af   : > { %913 = vrot.lane.b32.xlu0 %v691_v54, %s3023_s14  ;;  %895 = vrot.lane.b32.xlu2 %v691_v54, %s3031_s10 }
 0x1b0   : > { %939 = vrot.lane.b32.xlu1 %v3435_v39, %s3022_s13 }
 0x1b1   : > { %v3483_v13 = vpop.permute.xlu0 %780  ;;  %v3485_v14 = vpop.permute.xlu2 %816 }
 0x1b2   : > { %v3487_v15 = vpop.permute.xlu1 %808 }
 0x1b7   : > { %871 = vrot.lane.b32.xlu0 %v691_v54, %s3026_s24  ;;  %883 = vrot.lane.b32.xlu2 %v691_v54, %s3030_s9 }
 0x1b8   : > { %847 = vrot.lane.b32.xlu1 %v691_v54, %s3027_s27 }
 0x1b9   : > { %v735_v16 = vpop.permute.xlu0 %734  ;;  %v773_v17 = vpop.permute.xlu2 %772 }
 0x1ba   : > { %v3492_v19 = vpop.permute.xlu1 %812  ;;  %v1198_v20 = vsel %vm4844_vm1, %v1197_v12, %v735_v16  ;;  %v1199_v22 = vrot.slane %v735_v16, 4  ;;  %v1487_v27 = vrot.slane %v773_v17, 4  ;;  %v697_v12 = vadd.f32 %v696_v59, %v3333_v3  ;;  %vm4857_vm1 = vmmov %vm4843_vm0 }
 0x1bb   : > { %v3520_v43 = vperm.slane %v1198_v20, %v3131_v5 }
 0x1bc   : > { %v1200_v23 = vsel %vm4845_vm2, %v759_v36, %v1199_v22  ;;  %vm4858_vm2 = vmmov %vm4843_vm0 }
 0x1bd   : > { %v1208_v37 = vperm.slane %v1200_v23, %v3131_v5  ;;  %v1233_v51 = vrot.slane %v3520_v43, 4  ;;  %v1463_v23 = vrot.slane %v3378_v21, 4 }
 0x1bf   : > { %897 = vrot.lane.b32.xlu0 %v694_v24, %s3031_s10  ;;  %814 = vrot.lane.b32.xlu2 %v691_v54, %s3021_s12  ;;  %v1245_v40 = vrot.slane %v1208_v37, 4 }
 0x1c0   : > { %849 = vrot.lane.b32.xlu1 %v694_v24, %s3027_s27 }
 0x1c1   : > { %v795_v28 = vpop.permute.xlu0 %794  ;;  %v797_v29 = vpop.permute.xlu2 %796 }
 0x1c2   : > { %v771_v30 = vpop.permute.xlu1 %770  ;;  %v1209_v31 = vrot.slane %v795_v28, 4  ;;  %v1485_v32 = vrot.slane %v797_v29, 4  ;;  %v3501_v34 = vsel %vm4846_vm3, %v797_v29, %v1487_v27  ;;  %vm4859_vm3 = vmmov %vm4843_vm0 }
 0x1c3   : > { %v1211_v35 = vrot.slane %v771_v30, 4 }
 0x1c4   : > { %v3504_v33 = vsel %vm4847_vm4, %v1209_v31, %v771_v30  ;;  %v3507_v2 = vsel %vm4848_vm5, %v1485_v32, %v773_v17  ;;  %vm4860_vm4 = vmmov %vm4843_vm0 }
 0x1c5   : > { %v3510_v36 = vsel %vm4849_vm6, %v795_v28, %v1211_v35  ;;  %vm4861_vm5 = vmmov %vm4843_vm0 }
 0x1c6   : > { %vm4862_vm6 = vmmov %vm4843_vm0 }
 0x1c7   : > { %861 = vrot.lane.b32.xlu0 %v694_v24, %s3028_s29  ;;  %859 = vrot.lane.b32.xlu2 %v691_v54, %s3028_s29 }
 0x1c8   : > { %837 = vrot.lane.b32.xlu1 %v694_v24, %s3029_s7 }
 0x1c9   : > { %v954_v41 = vpop.permute.xlu2 %953  ;;  %v3517_v42 = vpop.permute.xlu0 %911 }
 0x1ca   : > { %v747_v45 = vpop.permute.xlu1 %746  ;;  %v1419_v6 = vrot.slane %v954_v41, 4  ;;  %v1424_v17 = vperm.slane %v954_v41, %v3131_v5 }
 0x1cb   : > { %v1185_v46 = vrot.slane %v747_v45, 4  ;;  %v1188_v48 = vsel %vm4850_vm7, %v747_v45, %v1187_v38  ;;  %vm4863_vm7 = vmmov %vm4843_vm0 }
 0x1cc   : > { %v1196_v49 = vperm.slane %v1188_v48, %v3131_v5  ;;  %v1420_v18 = vsel %vm4843_vm0, 0.0, %v1419_v6  ;;  %v1429_v28 = vrot.slane %v1424_v17, 4 }
 0x1cd   : > { %v1186_v50 = vsel %vm4851_vm8, %v1185_v46, %v3347_v11  ;;  %vm4864_vm8 = vmmov %vm4843_vm0 }
 0x1ce   : > { %v3528_v52 = vperm.slane %v1186_v50, %v3131_v5  ;;  %v3531_v53 = vsel %vm4852_vm10, %v1245_v40, %v1196_v49  ;;  %v1247_v54 = vrot.slane %v1196_v49, 4  ;;  %vm4865_vm10 = vmmov %vm4843_vm0 }
 0x1cf   : > { %818 = vrot.lane.b32.xlu0 %v694_v24, %s3021_s12  ;;  %873 = vrot.lane.b32.xlu2 %v694_v24, %s3026_s24 }
 0x1d0   : > { %v3536_v55 = vsel %vm4853_vm11, %v1208_v37, %v1247_v54  ;;  %917 = vrot.lane.b32.xlu1 %v694_v24, %s3023_s14  ;;  %v3541_v11 = vsel %vm4854_vm12, %v1233_v51, %v3528_v52  ;;  %vm4866_vm11 = vmmov %vm4843_vm0 }
 0x1d1   : > { %v3543_v57 = vpop.permute.xlu2 %738  ;;  %v737_v58 = vpop.permute.xlu0 %736  ;;  %vm4867_vm12 = vmmov %vm4843_vm0 }
 0x1d2   : > { %v761_v60 = vpop.permute.xlu1 %760  ;;  %v1475_v61 = vrot.slane %v737_v58, 4 }
 0x1d3   : > { %v1473_v63 = vrot.slane %v761_v60, 4 }
 0x1d4   : > { %v1476_v10 = vsel %vm4855_vm14, %v761_v60, %v1475_v61  ;;  %vm4868_vm14 = vmmov %vm4843_vm0 }
 0x1d5   : > { %v1474_v16 = vsel %vm4856_vm15, %v1473_v63, %v737_v58  ;;  %v1484_v22 = vperm.slane %v1476_v10, %v3131_v5  ;;  %vm4869_vm15 = vmmov %vm4843_vm0 }
 0x1d6   : > { %v3553_v20 = vperm.slane %v1474_v16, %v3131_v5 }
 0x1d7   : > { %899 = vrot.lane.b32.xlu0 %v697_v12, %s3031_s10  ;;  %885 = vrot.lane.b32.xlu2 %v694_v24, %s3030_s9  ;;  %v1428_v24 = vperm.slane %v1420_v18, %v3131_v5  ;;  %v1521_v45 = vrot.slane %v1484_v22, 4 }
 0x1d8   : > { %822 = vrot.lane.b32.xlu1 %v697_v12, %s3021_s12  ;;  %v1509_v41 = vrot.slane %v3553_v20, 4  ;;  %s2630_s12 = scalar_lea.hbm %s4798_s5, %s2788_s11 }
 0x1d9   : > { %v956_v3 = vpop.permute.xlu2 %955  ;;  %v749_v27 = vpop.permute.xlu0 %748  ;;  %v1441_v59 = vrot.slane %v1428_v24, 4 }
 0x1da   : > { %v946_v29 = vpop.permute.xlu1 %945  ;;  %v1695_v30 = vrot.slane %v956_v3, 4  ;;  %v1461_v31 = vrot.slane %v749_v27, 4  ;;  %v1464_v32 = vsel %vm4857_vm1, %v749_v27, %v1463_v23  ;;  %v1700_v50 = vperm.slane %v956_v3, %v3131_v5  ;;  %vm4870_vm1 = vmmov %vm4843_vm0 }
 0x1db   : > { %v1409_v35 = vrot.slane %v946_v29, 4  ;;  %v1414_v37 = vperm.slane %v946_v29, %v3131_v5  ;;  %v1472_v38 = vperm.slane %v1464_v32, %v3131_v5 }
 0x1dc   : > { %v1462_v46 = vsel %vm4858_vm2, %v1461_v31, %v3378_v21  ;;  %v1696_v54 = vsel %vm4861_vm5, 0.0, %v1695_v30  ;;  %v1705_v3 = vrot.slane %v1700_v50, 4  ;;  %vm4871_vm2 = vmmov %vm4843_vm0 }
 0x1dd   : > { %v1410_v48 = vsel %vm4859_vm3, 0.0, %v1409_v35  ;;  %v3567_v40 = vsel %vm4860_vm4, %v1429_v28, %v1414_v37  ;;  %v1431_v49 = vrot.slane %v1414_v37, 4  ;;  %v3573_v56 = vperm.slane %v1462_v46, %v3131_v5  ;;  %vm4872_vm3 = vmmov %vm4843_vm0 }
 0x1de   : > { %v1418_v51 = vperm.slane %v1410_v48, %v3131_v5  ;;  %v3576_v58 = vsel %vm4862_vm6, %v1521_v45, %v1472_v38  ;;  %v1523_v60 = vrot.slane %v1472_v38, 4  ;;  %v1704_v6 = vperm.slane %v1696_v54, %v3131_v5  ;;  %vm4873_vm4 = vmmov %vm4843_vm0 }
 0x1df   : > { %v3579_v21 = vsel %vm4863_vm7, %v1424_v17, %v1431_v49  ;;  %863 = vrot.lane.b32.xlu0 %v697_v12, %s3028_s29  ;;  %921 = vrot.lane.b32.xlu2 %v697_v12, %s3023_s14  ;;  %v3585_v63 = vsel %vm4864_vm8, %v1509_v41, %v3573_v56  ;;  %v1235_v37 = vrot.slane %v3528_v52, 4  ;;  %vm4877_vm5 = vmmov %vm4843_vm0  ;;  %s2633_s14 = sshll.u32 %s2630_s12, 4  ;;  %s2634_s14 = int_to_ptr.hbm [resolvable:$true] %s2633_s14 }
 0x1e0   : > { %v1443_v61 = vrot.slane %v1418_v51, 4  ;;  %875 = vrot.lane.b32.xlu1 %v697_v12, %s3026_s24  ;;  %v3590_v10 = vsel %vm4865_vm10, %v1484_v22, %v1523_v60  ;;  %v3595_v18 = vsel %vm4866_vm11, %v1441_v59, %v1418_v51  ;;  %v1717_v32 = vrot.slane %v1704_v6, 4  ;;  %v2912_v51 = vld [vmem:[%s4795_s2] ss:$0 sm:$0xff]  ;;  %vm4879_vm6 = vmmov %vm4843_vm0 }
 0x1e1   : > { %v948_v16 = vpop.permute.xlu2 %947  ;;  %v3592_v17 = vpop.permute.xlu0 %935  ;;  %v3625_v49 = vsel %vm4872_vm3, %v3520_v43, %v1235_v37  ;;  %v3642_v60 = vperm.slane %v3471_v7, %v3150_v26  ;;  %vm4880_vm7 = vmmov %vm4843_vm0  ;;  %vm824_vm10 = vcmask 15360  }
 0x1e2   : > { %v1444_v23 = vsel %vm4867_vm12, %v1428_v24, %v1443_v61  ;;  %v3598_v27 = vpop.permute.xlu1 %915  ;;  %v1685_v28 = vrot.slane %v948_v16, 4  ;;  %v1690_v29 = vperm.slane %v948_v16, %v3131_v5  ;;  %v3646_v61 = vperm.slane %v3468_v4, %v3150_v26  ;;  %vm4883_vm8 = vmmov %vm4843_vm0 }
 0x1e3   : > { %4875 = vst [vmem:[#allocation7_spill] sm:$0xff] %v3642_v60  ;;  %v1511_v16 = vrot.slane %v3573_v56, 4  ;;  %v3755_v4 = vperm.slane %v3585_v63, %v3150_v26  ;;  %vm4887_vm11 = vmmov %vm4843_vm0 }
 0x1e4   : > { %v1686_v30 = vsel %vm4868_vm14, 0.0, %v1685_v28  ;;  %v3603_v31 = vsel %vm4869_vm15, %v1705_v3, %v1690_v29  ;;  %v1707_v22 = vrot.slane %v1690_v29, 4  ;;  %vm4888_vm12 = vmmov %vm4843_vm0 }
 0x1e5   : > { %v1694_v35 = vperm.slane %v1686_v30, %v3131_v5  ;;  %4885 = vst [vmem:[#allocation13_spill] sm:$0xff] %v3755_v4  ;;  %vm4889_vm14 = vmmov %vm4843_vm0 }
 0x1e6   : > { %v3608_v38 = vsel %vm4843_vm0, %v1700_v50, %v1707_v22  ;;  %v3679_v22 = vperm.slane %v3504_v33, %v3131_v5  ;;  %v3700_v33 = vperm.slane %v3531_v53, %v3150_v26  ;;  %v3716_v53 = vperm.slane %v3595_v18, %v3150_v26  ;;  %vm4890_vm15 = vmmov %vm4843_vm0 }
 0x1e7   : > { %v3611_v24 = vsel %vm4870_vm1, %v1717_v32, %v1694_v35  ;;  %v1719_v41 = vrot.slane %v1694_v35, 4  ;;  %839 = vrot.lane.b32.xlu0 %v697_v12, %s3029_s7  ;;  %851 = vrot.lane.b32.xlu2 %v697_v12, %s3027_s27  ;;  %v3691_v32 = vperm.slane %v3507_v2, %v3131_v5  ;;  %v3707_v2 = vperm.slane %v1444_v23, %v3150_v26  ;;  %vm4892_vm1 = vmmov %vm4843_vm0  ;;  %s229_s7 = sand.u32 1, %s2977_s19   ;;  %s2935_s27 = scalar_lea.hbm %s4798_s5, 384 }
 0x1e8   : > { %887 = vrot.lane.b32.xlu1 %v697_v12, %s3030_s9  ;;  %vm4896_vm3 = vmmov %vm4843_vm0  ;;  %s2786_s9 = smul.u32 192, %s229_s7 }
 0x1e9   : > { %v3616_v45 = vpop.permute.xlu2 %919  ;;  %v3618_v46 = vpop.permute.xlu0 %820  ;;  %v3621_v48 = vsel %vm4871_vm2, %v1704_v6, %v1719_v41  ;;  %v3658_v6 = vperm.slane %v3477_v8, %v3131_v5  ;;  %4878 = vst [vmem:[#allocation9_spill] sm:$0xff] %v3691_v32  ;;  %vm4894_vm2 = vmmov %vm4843_vm0 }
 0x1ea   : > { %v763_v52 = vpop.permute.xlu1 %762  ;;  %s4697_s10 = scalar_lea.vmem [#allocation3], %s2786_s9 }
 0x1eb   : > { %v1743_v50 = vrot.slane %v763_v52, 4  ;;  %s2631_s13 = sshll.u32 %s4697_s10, 4  ;;  %s2632_s13 = int_to_ptr.vmem [resolvable:$true] %s2631_s13 }
 0x1ed   : > { %v1744_v12 = vsel %vm4873_vm4, %v1743_v50, %v3543_v57  ;;  %v3650_v57 = vperm.slane %v3457_v47, %v3150_v26  ;;  %v3666_v47 = vperm.slane %v3461_v62, %v3150_v26  ;;  %v3683_v62 = vsel %vm4877_vm5, %v3553_v20, %v1511_v16  ;;  %vm4897_vm4 = vmmov %vm4843_vm0 }
 0x1ee   : > { %v3694_v35 = vperm.slane %v1744_v12, %v3131_v5  ;;  %v3704_v20 = vperm.slane %v3536_v55, %v3150_v26  ;;  %v1436_v55 = vperm.slane %v3567_v40, %v3150_v26  ;;  %v3751_v16 = vperm.slane %v3611_v24, %v3150_v26  ;;  %vm4899_vm5 = vmmov %vm4843_vm0 }
 0x1ef   : > { %1879 = vperm.xlu0 %2910, %v2912_v51   ;;  %949 = vrot.lane.b32.xlu2 %v3435_v39, %s3024_s15  ;;  %4876 = vst [vmem:[#allocation8_spill] sm:$0xff] %v3666_v47  ;;  %v999_v51 = vrot.slane %v3483_v13, 4  ;;  %v1333_v40 = vrot.slane %v3592_v17, 4  ;;  %s2617_s15 = scalar_lea.sflag [#allocation4], %s229_s7 }
 0x1f0   : > { %957 = vrot.lane.b32.xlu1 %v3435_v39, %s3025_s17  ;;  %v3654_v39 = vperm.slane %v3474_v9, %v3131_v5  ;;  %v3670_v9 = vperm.slane %v3501_v34, %v3131_v5  ;;  %v3687_v34 = vperm.slane %v3510_v36, %v3131_v5  ;;  %v1761_v18 = vrot.slane %v3694_v35, 4  ;;  %4884 = vst [vmem:[#allocation12_spill] sm:$0xff] %v3751_v16  ;;  %s2929_s17 = sshra.s32 %s2634_s14, 4  ;;  %s2930_s17 = int_to_ptr.hbm [resolvable:$true] %s2929_s17 }
 0x1f1   : > { %v3636_v54 = vpop.permute.xlu0 %786  ;;  %v3638_v59 = vpop.permute.xlu2 %909  ;;  %v1453_v12 = vrot.slane %v1436_v55, 4  ;;  %v1733_v29 = vrot.slane %v3751_v16, 4  ;;  %s2931_s24 = scalar_lea.hbm %s2930_s17, 192  ;;  %p2936_p1 = scmp.lt.s32.totalorder %s2930_s17, %s4798_s5 }
 0x1f2   : > { %4874 = vst [vmem:[#allocation6_spill] sm:$0xff] %v3636_v54  ;;  %v799_v43 = vpop.permute.xlu1 %798  ;;  %p2932_p12 = scmp.ne.s32.totalorder %s2930_s17, %s2931_s24  ;;  %p2937_p2 = scmp.lt.s32.totalorder %s2935_s27, %s2931_s24 }
 0x1f3   : > { %v1749_v37 = vrot.slane %v799_v43, 4 }
 0x1f4   : > { %p2933_p13 = pnand %p2932_p12, %p3106_p4  ;;  %p2938_p3 = por %p2937_p2, %p2936_p1 }
 0x1f6   : > { %p2934_p0 = pneg %p2933_p13 }
 0x1f8   : > { %p2939_p5 = pnand %p2938_p3, %p2934_p0 }
 0x1f9   : > { %v751_v41 = vpop.permute.xlu0 %750  ;;  %v3696_v52 = vpop.permute.xlu2 %833 }
 0x1fa   : > { %v775_v36 = vpop.permute.xlu1 %774  ;;  %v1737_v50 = vrot.slane %v751_v41, 4  ;;  %v3725_v41 = vperm.slane %v3541_v11, %v3150_v26 }
 0x1fb   : > { %v3712_v43 = vsel %vm4879_vm6, %v1749_v37, %v775_v36  ;;  %v3730_v37 = vperm.slane %v3576_v58, %v3150_v26  ;;  %vm4900_vm6 = vmmov %vm4843_vm0 }
 0x1fc   : > { %v1738_v23 = vsel %vm4880_vm7, %v1737_v50, %v3405_v25  ;;  %v1459_v25 = vrot.slane %v3707_v2, 4  ;;  %v3742_v50 = vperm.slane %v3603_v31, %v3150_v26  ;;  %v3760_v31 = vperm.slane %v3579_v21, %v3150_v26  ;;  %vm4901_vm7 = vmmov %vm4843_vm0 }
 0x1fd   : > { %4881 = vst [vmem:[#allocation10_spill] sm:$0xff] %v3730_v37  ;;  %v3734_v36 = vperm.slane %v1738_v23, %v3131_v5  ;;  %v1457_v23 = vrot.slane %v3716_v53, 4 }
 0x1fe   : > { %4882 = vst [vmem:[#allocation11_spill] sm:$0xff] %v3742_v50  ;;  %v3773_v11 = vsel %vm4887_vm11, 0.0, %v1459_v25  ;;  %v1729_v28 = vrot.slane %v3742_v50, 4  ;;  %v3790_v25 = vperm.slane %v3608_v38, %v3150_v26  ;;  %v1075_v38 = vrot.slane %v3696_v52, 4  ;;  %vm4904_vm11 = vmmov %vm4843_vm0 }
 0x1ff   : > { %v3746_v58 = vsel %vm4883_vm8, %v1761_v18, %v3734_v36  ;;  %v3764_v18 = vperm.slane %v3590_v10, %v3150_v26  ;;  %v3779_v55 = vsel %vm4889_vm14, 0.0, %v1457_v23  ;;  %v4893_v23 = vrot.slane %v3654_v39, 4  ;;  %vm4903_vm8 = vmmov %vm4843_vm0 }
 0x200   : > { %4891 = vst [vmem:[#allocation15_spill] sm:$0xff] %v3790_v25  ;;  %v3803_v56 = vsel %vm4892_vm1, 0.0, %v1729_v28  ;;  %v3818_v28 = vsel %vm4897_vm4, 0.0, %v1733_v29  ;;  %vm4907_vm14 = vmmov %vm4843_vm0 }
 0x201   : > { %4886 = vst [vmem:[#allocation14_spill] sm:$0xff] %v3764_v18  ;;  %v870_v24 = vpop.permute.xlu0 %869  ;;  %v811_v7 = vpop.permute.xlu2 %810  ;;  %vm4910_vm1 = vmmov %vm4843_vm0 }
 0x202   : > { %v3768_v3 = vpop.permute.xlu1 %937  ;;  %v825_v63 = vsel %vm824_vm10, %v3487_v15, %v811_v7  ;;  %v3786_v7 = vsel %vm4890_vm15, 0.0, %v1453_v12  ;;  %v4895_v15 = vrot.slane %v3658_v6, 4  ;;  %vm4908_vm15 = vmmov %vm4843_vm0 }
 0x203   : > { %v997_v10 = vrot.slane %v825_v63, 4  ;;  %v1000_v8 = vsel %vm4888_vm12, %v825_v63, %v999_v51  ;;  %v3797_v63 = vperm.slane %v3621_v48, %v3150_v26  ;;  %v1085_v48 = vrot.slane %v870_v24, 4  ;;  %vm4906_vm12 = vmmov %vm4843_vm0 }
 0x204   : > { %v1008_v30 = vperm.slane %v1000_v8, %v3131_v5  ;;  %vm4915_vm4 = vmmov %vm4843_vm0 }
 0x205   : > { %v998_v51 = vsel %vm4843_vm0, %v997_v10, %v3483_v13  ;;  %v3809_v10 = vperm.slane %v3625_v49, %v3150_v26  ;;  %v1735_v18 = vrot.slane %v3797_v63, 4 }
 0x206   : > { %v1004_v8 = vperm.slane %v998_v51, %v3131_v5  ;;  %v1045_v21 = vrot.slane %v1008_v30, 4  ;;  %v1048_v12 = vsel %vm4896_vm3, %v1008_v30, %v4895_v15  ;;  %vm4913_vm3 = vmmov %vm4843_vm0 }
 0x207   : > { %v3833_v32 = vperm.slane %v1048_v12, %v3150_v26 }
 0x208   : > { %v1036_v51 = vsel %vm4894_vm2, %v1004_v8, %v4893_v23  ;;  %v1046_v49 = vsel %vm4899_vm5, %v1045_v21, %v3658_v6  ;;  %v1033_v23 = vrot.slane %v1004_v8, 4  ;;  %v4905_v8 = vrot.slane %v3642_v60, 4  ;;  %vm4912_vm2 = vmmov %vm4843_vm0 }
 0x209   : > { %v846_v16 = vpop.permute.xlu0 %845  ;;  %v896_v13 = vpop.permute.xlu2 %895  ;;  %v3822_v50 = vperm.slane %v1036_v51, %v3150_v26  ;;  %4902 = vst [vmem:[#allocation17_spill] sm:$0xff] %v3833_v32  ;;  %v4909_v60 = vrot.slane %v3650_v57, 4  ;;  %vm4917_vm5 = vmmov %vm4843_vm0 }
 0x20a   : > { %v1086_v4 = vsel %vm4900_vm6, %v1085_v48, %v846_v16  ;;  %v1087_v37 = vrot.slane %v846_v16, 4  ;;  %v1334_v30 = vsel %vm4901_vm7, %v1333_v40, %v896_v13  ;;  %v858_v29 = vpop.permute.xlu1 %857  ;;  %v1052_v40 = vperm.slane %v1046_v49, %v3150_v26  ;;  %vm4918_vm6 = vmmov %vm4843_vm0 }
 0x20b   : > { %4898 = vst [vmem:[#allocation16_spill] sm:$0xff] %v3822_v50  ;;  %v3830_v15 = vperm.slane %v1086_v4, %v3131_v5  ;;  %v1073_v54 = vrot.slane %v858_v29, 4  ;;  %v1076_v21 = vsel %vm4904_vm11, %v858_v29, %v1075_v38  ;;  %v1064_v16 = vsel %vm4906_vm12, %v3822_v50, %v4905_v8  ;;  %vm4919_vm7 = vmmov %vm4843_vm0 }
 0x20c   : > { %v1088_v6 = vsel %vm4903_vm8, %v870_v24, %v1087_v37  ;;  %1902 = vrot.lane.b32.xlu2 %v1064_v16, %s3033_s8  ;;  %v3848_v37 = vsel %vm4907_vm14, 0.0, %v1735_v18  ;;  %v925_v24 = vsel %vm618_vm9, %v3638_v59, %v3517_v42  ;;  %v1335_v38 = vrot.slane %v896_v13, 4  ;;  %vm4921_vm8 = vmmov %vm4843_vm0 }
 0x20d   : > { %v1096_v4 = vperm.slane %v1088_v6, %v3131_v5  ;;  %v1121_v48 = vrot.slane %v3830_v15, 4  ;;  %v1074_v49 = vsel %vm4908_vm15, %v1073_v54, %v3696_v52  ;;  %v1034_v29 = vsel %vm4843_vm0, %v1033_v23, %v3654_v39  ;;  %vm4924_vm11 = vmmov %vm4843_vm0 }
 0x20e   : > { %v1080_v8 = vperm.slane %v1074_v49, %v3131_v5  ;;  %v1084_v16 = vperm.slane %v1076_v21, %v3131_v5  ;;  %v1040_v12 = vperm.slane %v1034_v29, %v3150_v26  ;;  %v1069_v18 = vrot.slane %v3833_v32, 4  ;;  %vm4926_vm12 = vmmov %vm4843_vm0 }
 0x20f   : > { %v1133_v6 = vrot.slane %v1096_v4, 4  ;;  %v1065_v51 = vrot.slane %v1052_v40, 4  ;;  %v3864_v42 = vsel %vm4910_vm1, %v1052_v40, %v4909_v60  ;;  %v1731_v54 = vrot.slane %v3790_v25, 4  ;;  %vm4927_vm14 = vmmov %vm4843_vm0 }
 0x210   : > { %4911 = vst [vmem:[#allocation18_spill] sm:$0xff] %v3864_v42  ;;  %v1057_v13 = vrot.slane %v1040_v12, 4  ;;  %v1122_v23 = vsel %vm4912_vm2, %v1121_v48, %v1080_v8  ;;  %v1097_v49 = vrot.slane %v925_v24, 4  ;;  %v3881_v40 = vperm.slane %v3683_v62, %v3150_v26  ;;  %vm4928_vm15 = vmmov %vm4843_vm0 }
 0x211   : > { %v3867_v59 = vpop.permute.xlu0 %923  ;;  %v3869_v39 = vpop.permute.xlu2 %883  ;;  %v3876_v50 = vsel %vm4913_vm3, %v1065_v51, %v3650_v57  ;;  %v1134_v60 = vsel %vm4915_vm4, %v1133_v6, %v1084_v16  ;;  %v3885_v52 = vperm.slane %v3712_v43, %v3131_v5  ;;  %v1336_v48 = vsel %vm4917_vm5, %v3592_v17, %v1335_v38  ;;  %vm4930_vm1 = vmmov %vm4843_vm0 }
 0x212   : > { %v882_v29 = vpop.permute.xlu1 %881  ;;  %4914 = vst [vmem:[#allocation19_spill] sm:$0xff] %v3876_v50  ;;  %v1135_v21 = vrot.slane %v1084_v16, 4  ;;  %v3891_v42 = vperm.slane %v3746_v58, %v3150_v26  ;;  %v1763_v57 = vrot.slane %v3734_v36, 4  ;;  %v1070_v51 = vsel %vm4918_vm6, %v1069_v18, %v3666_v47  ;;  %vm4932_vm2 = vmmov %vm4843_vm0 }
 0x213   : > { %4916 = vst [vmem:[#allocation20_spill] sm:$0xff] %v3881_v40  ;;  %v3898_v62 = vsel %vm4919_vm7, %v1057_v13, %v3646_v61  ;;  %v3901_v43 = vsel %vm4921_vm8, 0.0, %v1731_v54  ;;  %v3904_v6 = vperm.slane %v1334_v30, %v3131_v5  ;;  %v1123_v17 = vrot.slane %v1080_v8, 4  ;;  %vm4934_vm3 = vmmov %vm4843_vm0 }
 0x214   : > { %4920 = vst [vmem:[#allocation21_spill] sm:$0xff] %v3898_v62  ;;  %v1099_v38 = vrot.slane %v882_v29, 4  ;;  %1932 = vrot.lane.b32.xlu2 %v1070_v51, %s3004_s25  ;;  %v4923_v58 = vrot.slane %v3646_v61, 4  ;;  %v3913_v16 = vperm.slane %v1336_v48, %v3131_v5  ;;  %v1098_v18 = vsel %vm4926_vm12, %v1097_v49, %v882_v29  ;;  %vm4936_vm4 = vmmov %vm4843_vm0 }
 0x215   : > { %4922 = vst [vmem:[#allocation22_spill] sm:$0xff] %v3901_v43  ;;  %v1136_v8 = vsel %vm4927_vm14, %v1096_v4, %v1135_v21  ;;  %v3925_v48 = vsel %vm4928_vm15, %v3694_v35, %v1763_v57  ;;  %v1104_v4 = vperm.slane %v1098_v18, %v3131_v5  ;;  %v1124_v61 = vsel %vm4930_vm1, %v3830_v15, %v1123_v17  ;;  %vm4937_vm5 = vmmov %vm4843_vm0 }
 0x216   : > { %v3910_v36 = vsel %vm4924_vm11, %v1040_v12, %v4923_v58  ;;  %4929 = vst [vmem:[#allocation24_spill] sm:$0xff] %v3925_v48  ;;  %v1100_v13 = vsel %vm4843_vm0, %v925_v24, %v1099_v38  ;;  %v1381_v51 = vrot.slane %v3913_v16, 4  ;;  %v3938_v49 = vperm.slane %v1136_v8, %v3150_v26  ;;  %vm4938_vm6 = vmmov %vm4843_vm0 }
 0x217   : > { %4925 = vst [vmem:[#allocation23_spill] sm:$0xff] %v3910_v36  ;;  %v3941_v29 = vperm.slane %v1122_v23, %v3150_v26  ;;  %v4931_v38 = vrot.slane %v3463_v0, 4  ;;  %v4933_v30 = vrot.slane %v3442_v44, 4  ;;  %v3950_v12 = vperm.slane %v1100_v13, %v3131_v5  ;;  %vm4939_vm7 = vmmov %vm4843_vm0 }
 0x218   : > { %v3955_v23 = vperm.slane %v1124_v61, %v3150_v26  ;;  %v1323_v8 = vrot.slane %v3869_v39, 4  ;;  %v1147_v58 = vrot.slane %v1104_v4, 4  ;;  %v3967_v36 = vperm.slane %v1134_v60, %v3150_v26  ;;  %vm4940_vm8 = vmmov %vm4843_vm0 }
 0x219   : > { %v836_v21 = vpop.permute.xlu0 %835  ;;  %v815_v54 = vpop.permute.xlu2 %814  ;;  %vm4942_vm11 = vmmov %vm4843_vm0 }
 0x21a   : > { %v826_v35 = vsel %vm824_vm10, %v3492_v19, %v815_v54  ;;  %v894_v57 = vpop.permute.xlu1 %893  ;;  %4935 = vst [vmem:[#allocation25_spill] sm:$0xff] %v3955_v23  ;;  %vm4943_vm12 = vmmov %vm4843_vm0 }
 0x21b   : > { %v1221_v24 = vrot.slane %v826_v35, 4  ;;  %v1224_v18 = vsel %vm4932_vm2, %v826_v35, %v4931_v38  ;;  %v1110_v15 = vsel %vm4934_vm3, %v4933_v30, %v894_v57  ;;  %v1111_v17 = vrot.slane %v894_v57, 4  ;;  %vm4944_vm14 = vmmov %vm4843_vm0 }
 0x21c   : > { %v1232_v19 = vperm.slane %v1224_v18, %v3131_v5  ;;  %v1116_v54 = vperm.slane %v1110_v15, %v3131_v5  ;;  %v1455_v38 = vrot.slane %v3760_v31, 4  ;;  %vm4945_vm15 = vmmov %vm4843_vm0 }
 0x21d   : > { %v1112_v35 = vsel %vm4936_vm4, %v3442_v44, %v1111_v17  ;;  %v1222_v30 = vsel %vm4937_vm5, %v1221_v24, %v3463_v0  ;;  %v1159_v44 = vrot.slane %v3950_v12, 4  ;;  %v1299_v17 = vrot.slane %v836_v21, 4  ;;  %vm4948_vm1 = vmmov %vm4843_vm0 }
 0x21e   : > { %v1269_v13 = vrot.slane %v1232_v19, 4  ;;  %v1120_v57 = vperm.slane %v1112_v35, %v3131_v5  ;;  %v1145_v15 = vrot.slane %v1116_v54, 4  ;;  %v1148_v61 = vsel %vm4938_vm6, %v1116_v54, %v1147_v58  ;;  %vm4949_vm2 = vmmov %vm4843_vm0 }
 0x21f   : > { %v1175_v0 = vrot.slane %v3955_v23, 4  ;;  %v1228_v24 = vperm.slane %v1222_v30, %v3131_v5  ;;  %v3978_v60 = vperm.slane %v1148_v61, %v3150_v26  ;;  %v4947_v61 = vrot.slane %v3687_v34, 4  ;;  %vm4951_vm3 = vmmov %vm4843_vm0 }
 0x220   : > { %v1270_v47 = vsel %vm4939_vm7, %v1269_v13, %v3687_v34  ;;  %v1146_v18 = vsel %vm4940_vm8, %v1145_v15, %v1104_v4  ;;  %v1160_v23 = vsel %vm4943_vm12, %v1120_v57, %v1159_v44  ;;  %v3990_v15 = vsel %vm4843_vm0, 0.0, %v1455_v38  ;;  %vm4952_vm4 = vmmov %vm4843_vm0 }
 0x221   : > { %v1276_v35 = vperm.slane %v1270_v47, %v3150_v26  ;;  %v914_v58 = vpop.permute.xlu0 %913  ;;  %v860_v54 = vpop.permute.xlu2 %859  ;;  %4941 = vst [vmem:[#allocation26_spill] sm:$0xff] %v3978_v60  ;;  %v1176_v4 = vsel %vm4945_vm15, %v3978_v60, %v1175_v0  ;;  %v3999_v44 = vperm.slane %v1160_v23, %v3150_v26  ;;  %vm4953_vm5 = vmmov %vm4843_vm0  ;;  %v1157_v23 = vrot.slane %v1120_v57, 4 }
 0x222   : > { %v926_v32 = vsel %vm618_vm9, %v914_v58, %v3598_v27  ;;  %v1297_v50 = vrot.slane %v860_v54, 4  ;;  %v1300_v25 = vsel %vm4942_vm11, %v860_v54, %v1299_v17  ;;  %v3983_v13 = vpop.permute.xlu1 %939  ;;  %4946 = vst [vmem:[#allocation27_spill] sm:$0xff] %v3990_v15  ;;  %v1272_v27 = vsel %vm4948_vm1, %v1232_v19, %v4947_v61  ;;  %1904 = vrot.lane.b32.xlu1 %v1176_v4, %s3033_s8  ;;  %vm4954_vm6 = vmmov %vm4843_vm0 }
 0x223   : > { %v1321_v30 = vrot.slane %v926_v32, 4  ;;  %v1324_v47 = vsel %vm4944_vm14, %v926_v32, %v1323_v8  ;;  %v4950_v32 = vrot.slane %v3679_v22, 4  ;;  %v4007_v34 = vperm.slane %v1300_v25, %v3131_v5  ;;  %vm4955_vm7 = vmmov %vm4843_vm0 }
 0x224   : > { %v1332_v58 = vperm.slane %v1324_v47, %v3131_v5  ;;  %v1298_v17 = vsel %vm4949_vm2, %v1297_v50, %v836_v21  ;;  %v1289_v19 = vrot.slane %v1276_v35, 4  ;;  %v1181_v47 = vrot.slane %v3999_v44, 4  ;;  %vm4956_vm8 = vmmov %vm4843_vm0 }
 0x225   : > { %v1260_v8 = vsel %vm4951_vm3, %v1228_v24, %v4950_v32  ;;  %v1322_v38 = vsel %vm4952_vm4, %v1321_v30, %v3869_v39  ;;  %v1304_v54 = vperm.slane %v1298_v17, %v3131_v5  ;;  %v1179_v39 = vrot.slane %v3967_v36, 4  ;;  %vm4957_vm11 = vmmov %vm4843_vm0 }
 0x226   : > { %v1328_v0 = vperm.slane %v1322_v38, %v3131_v5  ;;  %v1382_v50 = vsel %vm4953_vm5, %v1381_v51, %v1332_v58  ;;  %v1383_v21 = vrot.slane %v1332_v58, 4  ;;  %v4015_v4 = vsel %vm4954_vm6, %v1289_v19, %v3700_v33  ;;  %vm4959_vm12 = vmmov %vm4843_vm0 }
 0x227   : > { %v1257_v30 = vrot.slane %v1228_v24, 4  ;;  %v4019_v25 = vperm.slane %v1272_v27, %v3150_v26  ;;  %v4024_v58 = vperm.slane %v1260_v8, %v3150_v26  ;;  %v4027_v57 = vperm.slane %v1382_v50, %v3150_v26  ;;  %vm4960_vm14 = vmmov %vm4843_vm0 }
 0x228   : > { %v1371_v61 = vrot.slane %v1328_v0, 4  ;;  %v1384_v51 = vsel %vm4955_vm7, %v3913_v16, %v1383_v21  ;;  %v1359_v17 = vrot.slane %v4007_v34, 4  ;;  %v1347_v27 = vrot.slane %v1304_v54, 4  ;;  %vm4961_vm15 = vmmov %vm4843_vm0 }
 0x229   : > { %v872_v38 = vpop.permute.xlu0 %871  ;;  %v874_v19 = vpop.permute.xlu2 %873  ;;  %v4036_v16 = vperm.slane %v1146_v18, %v3150_v26  ;;  %v1182_v8 = vsel %vm4957_vm11, %v1181_v47, %v3938_v49  ;;  %v4958_v21 = vrot.slane %v3700_v33, 4  ;;  %v1158_v43 = vsel %vm4960_vm14, %v1157_v23, %v3950_v12  ;;  %vm4962_vm1 = vmmov %vm4843_vm0 }
 0x22a   : > { %v4033_v24 = vsel %vm4956_vm8, %v3904_v6, %v1371_v61  ;;  %v1309_v60 = vrot.slane %v872_v38, 4  ;;  %v848_v62 = vpop.permute.xlu1 %847  ;;  %1934 = vrot.lane.b32.xlu1 %v1182_v8, %s3004_s25  ;;  %v1392_v15 = vperm.slane %v1384_v51, %v3150_v26  ;;  %v1164_v48 = vperm.slane %v1158_v43, %v3150_v26  ;;  %vm4964_vm2 = vmmov %vm4843_vm0 }
 0x22b   : > { %v1311_v50 = vrot.slane %v848_v62, 4  ;;  %v4043_v32 = vsel %vm4959_vm12, %v1276_v35, %v4958_v21  ;;  %v1169_v18 = vrot.slane %v4036_v16, 4  ;;  %v1258_v35 = vsel %vm4962_vm1, %v1257_v30, %v3679_v22  ;;  %vm4965_vm4 = vmmov %vm4843_vm0 }
 0x22c   : > { %v1310_v61 = vsel %vm4961_vm15, %v1309_v60, %v848_v62  ;;  %v4963_v21 = vrot.slane %v3904_v6, 4  ;;  %vm1965_vm3 = vcmask 1046528   ;;  %v1177_v60 = vrot.slane %v1164_v48, 4  ;;  %vm4967_vm5 = vmmov %vm4843_vm0 }
 0x22d   : > { %v1312_v47 = vsel %vm4843_vm0, %v872_v38, %v1311_v50  ;;  %v1316_v33 = vperm.slane %v1310_v61, %v3131_v5  ;;  %v4062_v62 = vsel %vm4965_vm4, %v1169_v18, %v3941_v29  ;;  %v4065_v43 = vsel %vm4967_vm5, %v1164_v48, %v1179_v39  ;;  %vm4969_vm6 = vmmov %vm4843_vm0 }
 0x22e   : > { %v1370_v12 = vsel %vm4964_vm2, %v4963_v21, %v1328_v0  ;;  %v1320_v23 = vperm.slane %v1312_v47, %v3131_v5  ;;  %4966 = vst [vmem:[#allocation28_spill] sm:$0xff] %v4062_v62  ;;  %v4970_v22 = vrot.slane %v3704_v20, 4  ;;  %vm4971_vm7 = vmmov %vm4843_vm0  ;;  %v4073_v0 = vperm.slane %v1258_v35, %v3150_v26 }
 0x22f   : > { %4968 = vst [vmem:[#allocation29_spill] sm:$0xff] %v4065_v43  ;;  %v1345_v51 = vrot.slane %v1316_v33, 4  ;;  %v1348_v38 = vsel %vm4969_vm6, %v1316_v33, %v1347_v27  ;;  %vm4972_vm8 = vmmov %vm4843_vm0  ;;  %v2002_v50 = vrot.slane %v4015_v4, 1  ;;  %v1401_v47 = vrot.slane %v4027_v57, 4 }
 0x230   : > { %v1296_v6 = vsel %vm4971_vm7, %v4019_v25, %v4970_v22  ;;  %v1357_v30 = vrot.slane %v1320_v23, 4  ;;  %v1360_v8 = vsel %vm4972_vm8, %v1320_v23, %v1359_v17  ;;  %vm4973_vm11 = vmmov %vm4843_vm0  ;;  %v4082_v39 = vperm.slane %v1348_v38, %v3150_v26 }
 0x231   : > { %v4079_v48 = vsel %vm4973_vm11, %v1177_v60, %v3967_v36  ;;  %v1368_v27 = vperm.slane %v1360_v8, %v3150_v26  ;;  %v898_v61 = vpop.permute.xlu0 %897  ;;  %v4085_v18 = vpop.permute.xlu2 %885  ;;  %vm4975_vm12 = vmmov %vm4843_vm0  ;;  %v2050_v17 = vrot.slane %v1296_v6, 1  ;;  %v4976_v4 = vrot.slane %v3938_v49, 4 }
 0x232   : > { %4974 = vst [vmem:[#allocation30_spill] sm:$0xff] %v4079_v48  ;;  %v1346_v33 = vsel %vm4975_vm12, %v1345_v51, %v1304_v54  ;;  %v850_v35 = vpop.permute.xlu1 %849  ;;  %vm4977_vm14 = vmmov %vm4843_vm0  ;;  %v1405_v21 = vrot.slane %v1392_v15, 4  ;;  %v1281_v23 = vrot.slane %v4073_v0, 4  ;;  %v4978_v60 = vrot.slane %v3768_v3, 4 }
 0x233   : > { %v4093_v36 = vsel %vm4977_vm14, %v3999_v44, %v4976_v4  ;;  %vm4979_vm15 = vmmov %vm4843_vm0  ;;  %v1611_v22 = vrot.slane %v898_v61, 4  ;;  %v1587_v8 = vrot.slane %v850_v35, 4  ;;  %v1407_v62 = vrot.slane %v1368_v27, 4 }
 0x234   : > { %v1610_v38 = vsel %vm4979_vm15, %v4978_v60, %v898_v61  ;;  %v1585_v43 = vrot.slane %v874_v19, 4  ;;  %v1358_v54 = vsel %vm4843_vm0, %v1357_v30, %v4007_v34  ;;  %v2007_v49 = vrot.slane %v4043_v32, 1  ;;  %vm4980_vm1 = vmmov %vm4843_vm0 }
 0x235   : > { %v1406_v51 = vsel %vm4980_vm1, %v1405_v21, %v1368_v27  ;;  %vm4981_vm2 = vmmov %vm4843_vm0  ;;  %v1376_v48 = vperm.slane %v1370_v12, %v3150_v26  ;;  %v4108_v61 = vperm.slane %v1610_v38, %v3131_v5  ;;  %v1364_v34 = vperm.slane %v1358_v54, %v3150_v26 }
 0x236   : > { %v1588_v6 = vsel %vm4981_vm2, %v874_v19, %v1587_v8  ;;  %vm4982_vm4 = vmmov %vm4843_vm0  ;;  %v2013_v30 = vrot.slane %v1406_v51, 1  ;;  %v4986_v12 = vrot.slane %v3773_v11, 1 }
 0x237   : > { %v1408_v4 = vsel %vm4982_vm4, %v1392_v15, %v1407_v62  ;;  %vm4983_vm5 = vmmov %vm4843_vm0  ;;  %v1352_v15 = vperm.slane %v1346_v33, %v3150_v26  ;;  %v4120_v19 = vperm.slane %v1588_v6, %v3131_v5  ;;  %v4988_v33 = vrot.slane %v3707_v2, 1 }
 0x238   : > { %v1586_v60 = vsel %vm4983_vm5, %v1585_v43, %v850_v35  ;;  %v2051_v40 = vrot.slane %v1408_v4, 1  ;;  %vm4984_vm6 = vmmov %vm4843_vm0  ;;  %v1393_v51 = vrot.slane %v1376_v48, 4 }
 0x239   : > { %v1612_v32 = vsel %vm4984_vm6, %v3768_v3, %v1611_v22  ;;  %vm4985_vm7 = vmmov %vm4843_vm0  ;;  %v1592_v3 = vperm.slane %v1586_v60, %v3131_v5  ;;  %v922_v38 = vpop.permute.xlu2 %921  ;;  %v1403_v22 = vrot.slane %v1364_v34, 4  ;;  %v4132_v8 = vsel %vm1965_vm3, %v2013_v30, %v4988_v33 }
 0x23a   : > { %v4116_v27 = vsel %vm4985_vm7, %v1281_v23, %v3725_v41  ;;  %v2054_v62 = vsel %vm1965_vm3, %v2051_v40, %v4986_v12  ;;  %vm4987_vm8 = vmmov %vm4843_vm0  ;;  %v2052_v35 = vsel %vm1965_vm3, %v2050_v17, %v2051_v40  ;;  %v862_v23 = vpop.permute.xlu0 %861  ;;  %v838_v54 = vpop.permute.xlu1 %837  ;;  %v1395_v6 = vrot.slane %v1352_v15, 4 }
 0x23b   : > { %v1402_v43 = vsel %vm4987_vm8, %v1401_v47, %v1364_v34  ;;  %2067 = vrot.lane.b32.xlu2 %v2054_v62, %s3004_s25  ;;  %v1573_v11 = vrot.slane %v862_v23, 4  ;;  %v1293_v47 = vrot.slane %v4019_v25, 4  ;;  %v4136_v40 = vperm.slane %v1612_v32, %v3131_v5  ;;  %vm4990_vm11 = vmmov %vm4843_vm0 }
 0x23c   : > { %v2003_v21 = vrot.slane %v1402_v43, 1  ;;  %v4989_v17 = vrot.slane %v3716_v53, 1  ;;  %v1575_v34 = vrot.slane %v838_v54, 4  ;;  %v1633_v2 = vrot.slane %v4120_v19, 4  ;;  %vm4991_vm12 = vmmov %vm4843_vm0 }
 0x23d   : > { %v1574_v12 = vsel %vm4990_vm11, %v1573_v11, %v838_v54  ;;  %v1404_v25 = vsel %vm4991_vm12, %v4027_v57, %v1403_v22  ;;  %vm4992_vm14 = vmmov %vm4843_vm0  ;;  %v1294_v43 = vsel %vm4843_vm0, %v1293_v47, %v3704_v20  ;;  %v4995_v11 = vrot.slane %v3725_v41, 4 }
 0x23e   : > { %v2006_v4 = vsel %vm1965_vm3, %v2003_v21, %v4989_v17  ;;  %v2004_v60 = vsel %vm1965_vm3, %v2002_v50, %v2003_v21  ;;  %v4149_v32 = vsel %vm4992_vm14, %v1393_v51, %v1352_v15  ;;  %vm4993_vm15 = vmmov %vm4843_vm0  ;;  %v1580_v62 = vperm.slane %v1574_v12, %v3131_v5 }
 0x23f   : > { %2019 = vrot.lane.b32.xlu0 %v2006_v4, %s3033_s8  ;;  %2017 = vrot.lane.b32.xlu1 %v2004_v60, %s3033_s8  ;;  %v1576_v53 = vsel %vm4993_vm15, %v862_v23, %v1575_v34  ;;  %v2008_v50 = vrot.slane %v1404_v25, 1  ;;  %v2012_v33 = vrot.slane %v1294_v43, 1  ;;  %vm4994_vm1 = vmmov %vm4843_vm0  ;;  %v4167_v15 = vsel %vm618_vm9, %v922_v38, %v3867_v59 }
 0x240   : > { %v1584_v21 = vperm.slane %v1576_v53, %v3131_v5  ;;  %v4157_v17 = vsel %vm4994_vm1, %v1376_v48, %v1395_v6  ;;  %vm4996_vm2 = vmmov %vm4843_vm0  ;;  %v1623_v23 = vrot.slane %v1580_v62, 4  ;;  %v4997_v20 = vrot.slane %v3779_v55, 1 }
 0x241   : > { %v4163_v57 = vsel %vm4996_vm2, %v4073_v0, %v4995_v11  ;;  %v4170_v22 = vsel %vm1965_vm3, %v2007_v49, %v2008_v50  ;;  %v1645_v48 = vrot.slane %v4108_v61, 4  ;;  %v1599_v41 = vrot.slane %v4085_v18, 4  ;;  %vm4998_vm4 = vmmov %vm4843_vm0 }
 0x242   : > { %v4175_v54 = vsel %vm1965_vm3, %v2008_v50, %v4997_v20  ;;  %v1621_v51 = vrot.slane %v1592_v3, 4  ;;  %v4180_v0 = vsel %vm1965_vm3, %v2012_v33, %v2013_v30  ;;  %v1657_v59 = vrot.slane %v4136_v40, 4  ;;  %vm4999_vm5 = vmmov %vm4843_vm0  ;;  %v819_v6 = vpop.permute.xlu0 %818  ;;  %v918_v34 = vpop.permute.xlu1 %917 }
 0x243   : > { %v1624_v38 = vsel %vm4998_vm4, %v1592_v3, %v1623_v23  ;;  %v1634_v49 = vsel %vm4999_vm5, %v1633_v2, %v1584_v21  ;;  %v1967_v55 = vrot.slane %v4157_v17, 1  ;;  %vm5000_vm6 = vmmov %vm4843_vm0  ;;  %v827_v60 = vsel %vm824_vm10, %v3485_v14, %v819_v6  ;;  %v4194_v2 = vpop.permute.xlu2 %851 }
 0x244   : > { %v1622_v4 = vsel %vm5000_vm6, %v1621_v51, %v1580_v62  ;;  %v1635_v12 = vrot.slane %v1584_v21, 4  ;;  %v1497_v25 = vrot.slane %v827_v60, 4  ;;  %v5001_v53 = vrot.slane %v3465_v1, 4  ;;  %vm5002_vm7 = vmmov %vm4843_vm0 }
 0x245   : > { %v927_v50 = vsel %vm618_vm9, %v918_v34, %v3616_v45  ;;  %vm2098_vm8 = vcmask 1045504   ;;  %v4199_v62 = vperm.slane %v1634_v49, %v3150_v26  ;;  %vm5003_vm11 = vmmov %vm4843_vm0  ;;  %v4205_v33 = vperm.slane %v1622_v4, %v3150_v26 }
 0x246   : > { %v1500_v3 = vsel %vm5002_vm7, %v827_v60, %v5001_v53  ;;  %v1597_v43 = vrot.slane %v927_v50, 4  ;;  %v1600_v21 = vsel %vm5003_vm11, %v927_v50, %v1599_v41  ;;  %vm5004_vm12 = vmmov %vm4843_vm0  ;;  %v5005_v45 = vrot.slane %v3786_v7, 1 }
 0x247   : > { %2065 = vrot.lane.b32.xlu0 %v2052_v35, %s3004_s25  ;;  %v1508_v14 = vperm.slane %v1500_v3, %v3131_v5  ;;  %v1498_v11 = vsel %vm5004_vm12, %v1497_v25, %v3465_v1  ;;  %v1608_v23 = vperm.slane %v1600_v21, %v3131_v5  ;;  %vm5006_vm9 = vmmov %vm4843_vm0  ;;  %v4226_v60 = vperm.slane %v1624_v38, %v3150_v26 }
 0x248   : > { %v4215_v20 = vsel %vm1965_vm3, %v1967_v55, %v5005_v45  ;;  %v1504_v35 = vperm.slane %v1498_v11, %v3131_v5  ;;  %v1598_v41 = vsel %vm5006_vm9, %v1597_v43, %v4085_v18  ;;  %vm5007_vm14 = vmmov %vm4843_vm0  ;;  %v5009_v34 = vrot.slane %v3670_v9, 4 }
 0x249   : > { %v1545_v51 = vrot.slane %v1508_v14, 4  ;;  %v1604_v6 = vperm.slane %v1598_v41, %v3131_v5  ;;  %v1658_v1 = vsel %vm5007_vm14, %v1657_v59, %v1608_v23  ;;  %v1659_v4 = vrot.slane %v1608_v23, 4  ;;  %vm5008_vm15 = vmmov %vm4843_vm0 }
 0x24a   : > { %v1636_v7 = vsel %vm5008_vm15, %v4120_v19, %v1635_v12  ;;  %v1548_v25 = vsel %vm4843_vm0, %v1508_v14, %v5009_v34  ;;  %v4232_v53 = vperm.slane %v1658_v1, %v3150_v26  ;;  %v1679_v18 = vrot.slane %v4199_v62, 4  ;;  %vm5010_vm1 = vmmov %vm4843_vm0  ;;  %v900_v12 = vpop.permute.xlu0 %899  ;;  %v823_v21 = vpop.permute.xlu1 %822 }
 0x24b   : > { %v1533_v3 = vrot.slane %v1504_v35, 4  ;;  %v1546_v59 = vsel %vm5010_vm1, %v1545_v51, %v3670_v9  ;;  %v1647_v50 = vrot.slane %v1604_v6, 4  ;;  %vm5011_vm2 = vmmov %vm4843_vm0  ;;  %v1671_v38 = vrot.slane %v4205_v33, 4  ;;  %v950_v34 = vpop.permute.xlu2 %949 }
 0x24c   : > { %v1660_v19 = vsel %vm5011_vm2, %v4136_v40, %v1659_v4  ;;  %vm5012_vm4 = vmmov %vm4843_vm0  ;;  %v4245_v11 = vperm.slane %v1636_v7, %v3150_v26  ;;  %v1556_v23 = vperm.slane %v1548_v25, %v3150_v26  ;;  %v828_v40 = vsel %vm824_vm10, %v3618_v46, %v823_v21  ;;  %v5024_v21 = vld [vmem:[#allocation10_spill] sm:$0xff] }
 0x24d   : > { %v1646_v43 = vsel %vm5012_vm4, %v1645_v48, %v1604_v6  ;;  %v4242_v14 = vperm.slane %v1660_v19, %v3150_v26  ;;  %vm5013_vm5 = vmmov %vm4843_vm0  ;;  %v5015_v48 = vld [vmem:[#allocation9_spill] sm:$0xff]  ;;  %v1755_v6 = vrot.slane %v828_v40, 4  ;;  %v4260_v4 = vperm.slane %v1546_v59, %v3150_v26 }
 0x24e   : > { %v4250_v9 = vsel %vm5013_vm5, %v4108_v61, %v1647_v50  ;;  %vm5014_vm6 = vmmov %vm4843_vm0  ;;  %v5016_v51 = vrot.slane %v5015_v48, 4  ;;  %v5018_v7 = vrot.slane %v3983_v13, 4  ;;  %v5021_v50 = vld [vmem:[#allocation6_spill] sm:$0xff]  ;;  %v5023_v19 = vrot.slane %v3818_v28, 2 }
 0x24f   : > { %v1680_v45 = vsel %vm5014_vm6, %v4232_v53, %v1679_v18  ;;  %vm5017_vm7 = vmmov %vm4843_vm0  ;;  %v1681_v25 = vrot.slane %v4242_v14, 4  ;;  %v1652_v18 = vperm.slane %v1646_v43, %v3150_v26  ;;  %v5025_v40 = vrot.slane %v5024_v21, 4 }
 0x250   : > { %v1536_v41 = vsel %vm5017_vm7, %v1504_v35, %v5016_v51  ;;  %v2136_v1 = vrot.slane %v1680_v45, 2  ;;  %vm5019_vm11 = vmmov %vm4843_vm0  ;;  %v4284_v28 = vperm.slane %v950_v34, %v3131_v5 }
 0x251   : > { %v1810_v61 = vsel %vm5019_vm11, %v5018_v7, %v900_v12  ;;  %vm5020_vm10 = vmmov %vm4843_vm0  ;;  %v1569_v7 = vrot.slane %v1556_v23, 4 }
 0x252   : > { %v1534_v46 = vsel %vm5020_vm10, %v1533_v3, %v5015_v48  ;;  %vm5022_vm12 = vmmov %vm4843_vm0  ;;  %v2139_v59 = vsel %vm2098_vm8, %v2136_v1, %v5023_v19  ;;  %v1669_v48 = vrot.slane %v1652_v18, 4 }
 0x253   : > { %v1756_v35 = vsel %vm5022_vm12, %v1755_v6, %v5021_v50  ;;  %vm5026_vm9 = vmmov %vm4843_vm0  ;;  %v1540_v12 = vperm.slane %v1534_v46, %v3150_v26  ;;  %2152 = vrot.lane.b32.xlu1 %v2139_v59, %s3033_s8  ;;  %v4287_v50 = vperm.slane %v1810_v61, %v3131_v5 }
 0x254   : > { %v1568_v13 = vsel %vm5026_vm9, %v4260_v4, %v5025_v40  ;;  %v1760_v45 = vperm.slane %v1756_v35, %v3131_v5  ;;  %vm5027_vm14 = vmmov %vm4843_vm0  ;;  %v864_v35 = vpop.permute.xlu0 %863  ;;  %v5029_v40 = vrot.slane %v3797_v63, 2 }
 0x255   : > { %v2135_v3 = vrot.slane %v1568_v13, 2  ;;  %v1682_v43 = vsel %vm5027_vm14, %v1681_v25, %v4245_v11  ;;  %v1557_v6 = vrot.slane %v1540_v12, 4  ;;  %vm5028_vm15 = vmmov %vm4843_vm0  ;;  %v876_v25 = vpop.permute.xlu1 %875  ;;  %v5030_v13 = vld [vmem:[#allocation13_spill] sm:$0xff] }
 0x256   : > { %v2141_v51 = vrot.slane %v1682_v43, 2  ;;  %v1773_v19 = vrot.slane %v1760_v45, 4  ;;  %v1670_v59 = vsel %vm5028_vm15, %v1669_v48, %v4205_v33  ;;  %v5031_v44 = vrot.slane %v5030_v13, 4  ;;  %vm5032_vm1 = vmmov %vm4843_vm0 }
 0x257   : > { %v2137_v46 = vsel %vm2098_vm8, %v2135_v3, %v2136_v1  ;;  %v1558_v43 = vsel %vm4843_vm0, %v1557_v6, %v5030_v13  ;;  %v2056_v61 = vrot.slane %v1670_v59, 1  ;;  %v1797_v3 = vrot.slane %v876_v25, 4  ;;  %vm5033_vm2 = vmmov %vm4843_vm0 }
 0x258   : > { %2150 = vrot.lane.b32.xlu2 %v2137_v46, %s3033_s8  ;;  %v4296_v34 = vsel %vm2098_vm8, %v2141_v51, %v5029_v40  ;;  %v1560_v1 = vsel %vm5032_vm1, %v1540_v12, %v5031_v44  ;;  %v1774_v33 = vsel %vm5033_vm2, %v1773_v19, %v3885_v52  ;;  %v2055_v48 = vrot.slane %v1558_v43, 1  ;;  %v5034_v46 = vld [vmem:[#allocation14_spill] sm:$0xff]  ;;  %vm5035_vm4 = vmmov %vm4843_vm0  ;;  %v5036_v40 = vld [vmem:[#allocation11_spill] sm:$0xff] }
 0x259   : > { %v1570_v47 = vsel %vm5035_vm4, %v1569_v7, %v5034_v46  ;;  %v1780_v63 = vperm.slane %v1774_v33, %v3150_v26  ;;  %v5037_v30 = vrot.slane %v5036_v40, 1  ;;  %vm5038_vm5 = vmmov %vm4843_vm0  ;;  %v2060_v19 = vrot.slane %v1560_v1, 1 }
 0x25a   : > { %v2140_v6 = vrot.slane %v1570_v47, 2  ;;  %v1672_v59 = vsel %vm5038_vm5, %v1652_v18, %v1671_v38  ;;  %vm5039_vm6 = vmmov %vm4843_vm0  ;;  %v4317_v12 = vsel %vm1965_vm3, %v2055_v48, %v2056_v61  ;;  %v1675_v7 = vrot.slane %v4226_v60, 4  ;;  %v2913_v47 = vld [vmem:[%s4795_s2 + $0x1] ss:$0 sm:$0xff] }
 0x25b   : > { %v4311_v49 = vsel %vm1965_vm3, %v2056_v61, %v5037_v30  ;;  %v1798_v44 = vsel %vm5039_vm6, %v1797_v3, %v4194_v2  ;;  %v2061_v25 = vrot.slane %v1672_v59, 1  ;;  %v4321_v13 = vperm.slane %v1536_v41, %v3150_v26  ;;  %vm5042_vm7 = vmmov %vm4843_vm0 }
 0x25c   : > { %v1802_v43 = vperm.slane %v1798_v44, %v3131_v5  ;;  %v4328_v30 = vsel %vm2098_vm8, %v2140_v6, %v2141_v51  ;;  %v1857_v2 = vrot.slane %v4284_v28, 4  ;;  %v5040_v18 = vrot.slane %v3803_v56, 1  ;;  %vm5044_vm11 = vmmov %vm4843_vm0  ;;  %v840_v59 = vpop.permute.xlu0 %839 }
 0x25d   : > { %v4332_v38 = vsel %vm1965_vm3, %v2060_v19, %v2061_v25  ;;  %v5041_v41 = vrot.slane %v5034_v46, 4  ;;  %v1827_v3 = vrot.slane %v4287_v50, 4  ;;  %v1791_v33 = vrot.slane %v864_v35, 4  ;;  %vm5047_vm10 = vmmov %vm4843_vm0  ;;  %v888_v17 = vpop.permute.xlu1 %887 }
 0x25e   : > { %v4337_v61 = vsel %vm1965_vm3, %v2061_v25, %v5040_v18  ;;  %v1785_v48 = vrot.slane %v1780_v63, 4  ;;  %v1683_v51 = vrot.slane %v4245_v11, 4  ;;  %v5043_v40 = vrot.slane %v3885_v52, 4  ;;  %vm5048_vm12 = vmmov %vm4843_vm0 }
 0x25f   : > { %v1572_v1 = vsel %vm5042_vm7, %v1556_v23, %v5041_v41  ;;  %v5045_v56 = vrot.slane %v4163_v57, 1  ;;  %v5046_v23 = vrot.slane %v3941_v29, 4  ;;  %v4364_v52 = vperm.slane %v4033_v24, %v3150_v26  ;;  %vm5049_vm9 = vmmov %vm4843_vm0 }
 0x260   : > { %v4347_v6 = vsel %vm5044_vm11, %v1760_v45, %v5043_v40  ;;  %v1815_v11 = vrot.slane %v1802_v43, 4  ;;  %1883 = vperm.xlu2 %2911, %v2913_v47   ;;  %v1792_v45 = vsel %vm5048_vm12, %v1791_v33, %v840_v59  ;;  %v1684_v57 = vsel %vm5049_vm9, %v4242_v14, %v1683_v51  ;;  %vm5051_vm14 = vmmov %vm4843_vm0 }
 0x261   : > { %v4354_v46 = vsel %vm1965_vm3, %v5045_v56, %v1967_v55  ;;  %v4360_v35 = vsel %vm5047_vm10, %v4036_v16, %v5046_v23  ;;  %v5050_v55 = vrot.slane %v4024_v58, 4  ;;  %v1796_v16 = vperm.slane %v1792_v45, %v3131_v5  ;;  %vm5053_vm15 = vmmov %vm4843_vm0 }
 0x262   : > { %v5052_v44 = vrot.slane %v4167_v15, 4  ;;  %v2145_v19 = vrot.slane %v1572_v1, 2  ;;  %v2146_v25 = vrot.slane %v1684_v57, 2  ;;  %v1786_v18 = vsel %vm4843_vm0, %v1785_v48, %v3891_v42  ;;  %vm5055_vm1 = vmmov %vm4843_vm0 }
 0x263   : > { %v1286_v29 = vsel %vm5051_vm14, %v5050_v55, %v3809_v10  ;;  %v5054_v14 = vrot.slane %v3891_v42, 4  ;;  %v1397_v33 = vrot.slane %v4364_v52, 4  ;;  %vm5056_vm2 = vmmov %vm4843_vm0  ;;  %v1817_v40 = vrot.slane %v1796_v16, 4 }
 0x264   : > { %v1804_v24 = vsel %vm5053_vm15, %v5052_v44, %v888_v17  ;;  %v1816_v51 = vsel %vm5056_vm2, %v1815_v11, %v1796_v16  ;;  %v4386_v15 = vsel %vm2098_vm8, %v2145_v19, %v2146_v25  ;;  %v5057_v1 = vrot.slane %v3848_v37, 2  ;;  %vm5058_vm4 = vmmov %vm4843_vm0 }
 0x265   : > { %v1808_v47 = vperm.slane %v1804_v24, %v3131_v5  ;;  %v1788_v41 = vsel %vm5055_vm1, %v1780_v63, %v5054_v14  ;;  %v1822_v56 = vperm.slane %v1816_v51, %v3150_v26  ;;  %vm5059_vm5 = vmmov %vm4843_vm0  ;;  %v1971_v17 = vrot.slane %v1286_v29, 1 }
 0x266   : > { %v4391_v59 = vsel %vm2098_vm8, %v2146_v25, %v5057_v1  ;;  %v1398_v63 = vsel %vm5059_vm5, %v1397_v33, %v4082_v39  ;;  %vm5060_vm6 = vmmov %vm4843_vm0  ;;  %v2188_v55 = vrot.slane %v1788_v41, 2  ;;  %v5062_v16 = vrot.slane %v3809_v10, 4  ;;  %v958_v10 = vpop.permute.xlu1 %957 }
 0x267   : > { %v1828_v48 = vsel %vm5058_vm4, %v1827_v3, %v1808_v47  ;;  %v1829_v42 = vrot.slane %v1808_v47, 4  ;;  %v1818_v23 = vsel %vm5060_vm6, %v1802_v43, %v1817_v40  ;;  %v1972_v45 = vrot.slane %v1398_v63, 1  ;;  %vm5061_vm7 = vmmov %vm4843_vm0  ;;  %v5067_v40 = vld [vmem:[#allocation20_spill] sm:$0xff] }
 0x268   : > { %v1834_v11 = vperm.slane %v1828_v48, %v3150_v26  ;;  %v1841_v57 = vrot.slane %v1822_v56, 4  ;;  %vm5063_vm11 = vmmov %vm4843_vm0  ;;  %v5064_v19 = vrot.slane %v3760_v31, 1  ;;  %v1826_v25 = vperm.slane %v1818_v23, %v3150_v26  ;;  %1938 = vrot.lane.b32.xlu2 %v4093_v36, %s3004_s25 }
 0x269   : > { %v1830_v37 = vsel %vm5061_vm7, %v4287_v50, %v1829_v42  ;;  %v1288_v3 = vsel %vm5063_vm11, %v4024_v58, %v5062_v16  ;;  %v4412_v29 = vsel %vm1965_vm3, %v1971_v17, %v1972_v45  ;;  %v2183_v50 = vrot.slane %v1786_v18, 2  ;;  %vm5065_vm10 = vmmov %vm4843_vm0  ;;  %v5073_v17 = vld [vmem:[#allocation27_spill] sm:$0xff] }
 0x26a   : > { %v1838_v44 = vperm.slane %v1830_v37, %v3150_v26  ;;  %v1839_v24 = vrot.slane %v1834_v11, 4  ;;  %v4409_v43 = vsel %vm1965_vm3, %v1972_v45, %v5064_v19  ;;  %v4418_v58 = vsel %vm5065_vm10, %v1834_v11, %v1841_v57  ;;  %vm5066_vm12 = vmmov %vm4843_vm0  ;;  %v5072_v11 = vld [vmem:[#allocation24_spill] sm:$0xff]  ;;  %v1903_v37 = vpop.permute.xlu2 %1902 }
 0x26b   : > { %v1561_v47 = vrot.slane %v4321_v13, 4  ;;  %v1854_v31 = vperm.slane %v958_v10, %v3131_v5  ;;  %v2189_v33 = vrot.slane %v4418_v58, 2  ;;  %vm5068_vm9 = vmmov %vm4843_vm0  ;;  %v1656_v36 = vperm.slane %v4250_v9, %v3150_v26  ;;  %v1880_v10 = vpop.permute.xlu0 %1879 }
 0x26c   : > { %v1843_v14 = vrot.slane %v1838_v44, 4  ;;  %v1840_v41 = vsel %vm5066_vm12, %v1839_v24, %v1822_v56  ;;  %v5069_v18 = vrot.slane %v5067_v40, 4  ;;  %vm5070_vm14 = vmmov %vm4843_vm0  ;;  %v1772_v45 = vperm.slane %v5072_v11, %v3150_v26 }
 0x26d   : > { %v2184_v51 = vrot.slane %v1840_v41, 2  ;;  %v1562_v1 = vsel %vm5068_vm9, %v1561_v47, %v5067_v40  ;;  %v1855_v42 = vrot.slane %v1854_v31, 4  ;;  %vm5071_vm15 = vmmov %vm4843_vm0  ;;  %v2190_v56 = vsel %vm2098_vm8, %v2188_v55, %v2189_v33 }
 0x26e   : > { %v1564_v48 = vsel %vm5070_vm14, %v4321_v13, %v5069_v18  ;;  %v1858_v5 = vsel %vm5071_vm15, %v1854_v31, %v1857_v2  ;;  %v1844_v63 = vsel %vm4843_vm0, %v1843_v14, %v1826_v25  ;;  %v1979_v13 = vrot.slane %v5073_v17, 1  ;;  %vm5074_vm1 = vmmov %vm4843_vm0 }
 0x26f   : > { %v1868_v23 = vperm.slane %v1858_v5, %v3150_v26  ;;  %v2185_v9 = vsel %vm2098_vm8, %v2183_v50, %v2184_v51  ;;  %v1856_v57 = vsel %vm5074_vm1, %v1855_v42, %v4284_v28  ;;  %v2194_v2 = vrot.slane %v1844_v63, 2  ;;  %vm5075_vm2 = vmmov %vm4843_vm0  ;;  %v5082_v5 = vld [vmem:[#allocation15_spill] sm:$0xff] }
 0x270   : > { %2198 = vrot.lane.b32.xlu1 %v2185_v9, %s3004_s25  ;;  %v1673_v16 = vrot.slane %v1656_v36, 4  ;;  %v1676_v55 = vsel %vm5075_vm2, %v1656_v36, %v1675_v7  ;;  %v1862_v44 = vperm.slane %v1856_v57, %v3150_v26  ;;  %v2099_v19 = vrot.slane %v1562_v1, 2  ;;  %vm5076_vm4 = vmmov %vm4843_vm0  ;;  %2021 = vrot.lane.b32.xlu2 %v4170_v22, %s3033_s8 }
 0x271   : > { %v2196_v24 = vrot.slane %v1868_v23, 2  ;;  %v1784_v25 = vperm.slane %v4347_v6, %v3150_v26  ;;  %v2105_v50 = vrot.slane %v1676_v55, 2  ;;  %v2104_v47 = vrot.slane %v1564_v48, 2  ;;  %vm5078_vm5 = vmmov %vm4843_vm0  ;;  %v5079_v6 = vld [vmem:[#allocation22_spill] sm:$0xff]  ;;  %v5081_v48 = vld [vmem:[#allocation21_spill] sm:$0xff] }
 0x272   : > { %v1674_v28 = vsel %vm5076_vm4, %v1673_v16, %v4226_v60  ;;  %v5077_v14 = vrot.slane %v4082_v39, 4  ;;  %v2186_v7 = vrot.slane %v1862_v44, 2  ;;  %v1976_v1 = vrot.slane %v1288_v3, 1  ;;  %vm5084_vm6 = vmmov %vm4843_vm0  ;;  %v1933_v57 = vpop.permute.xlu2 %1932 }
 0x273   : > { %v2197_v41 = vsel %vm2098_vm8, %v2194_v2, %v2196_v24  ;;  %v2100_v40 = vrot.slane %v1674_v28, 2  ;;  %v1789_v26 = vrot.slane %v1784_v25, 4  ;;  %v5080_v36 = vrot.slane %v5079_v6, 2  ;;  %v5086_v24 = vld [vmem:[#allocation30_spill] sm:$0xff]  ;;  %vm5091_vm7 = vmmov %vm4843_vm0 }
 0x274   : > { %v1400_v31 = vsel %vm5078_vm5, %v4364_v52, %v5077_v14  ;;  %v4468_v18 = vsel %vm2098_vm8, %v2104_v47, %v2105_v50  ;;  %v1890_v52 = vadd.f32 %v1880_v10, %v5081_v48  ;;  %v2187_v42 = vsel %vm2098_vm8, %v2184_v51, %v2186_v7  ;;  %v5085_v51 = vld [vmem:[#allocation19_spill] sm:$0xff]  ;;  %v5090_v47 = vld [vmem:[#allocation17_spill] sm:$0xff]  ;;  %vm5092_vm11 = vmmov %vm4843_vm0 }
 0x275   : > { %v4465_v60 = vsel %vm2098_vm8, %v2105_v50, %v5080_v36  ;;  %v1977_v39 = vrot.slane %v1400_v31, 1  ;;  %v4473_v22 = vsel %vm2098_vm8, %v2099_v19, %v2100_v40  ;;  %v5083_v63 = vrot.slane %v5082_v5, 2  ;;  %2200 = vrot.lane.b32.xlu0 %v2187_v42, %s3004_s25  ;;  %vm5093_vm10 = vmmov %vm4843_vm0  ;;  %v5094_v7 = vld [vmem:[#allocation18_spill] sm:$0xff] }
 0x276   : > { %v1790_v23 = vsel %vm5084_vm6, %v1789_v26, %v1772_v45  ;;  %v1920_v17 = vadd.f32 %v1903_v37, %v1890_v52  ;;  %v1677_v45 = vrot.slane %v4232_v53, 4  ;;  %v1565_v19 = vrot.slane %v4260_v4, 4  ;;  %vm5103_vm12 = vmmov %vm4843_vm0 }
 0x277   : > { %v2103_v3 = vsel %vm2098_vm8, %v2100_v40, %v5083_v63  ;;  %v4481_v9 = vsel %vm1965_vm3, %v1977_v39, %v1979_v13  ;;  %v4484_v11 = vsel %vm1965_vm3, %v1976_v1, %v1977_v39  ;;  %v5087_v13 = vld [vmem:[#allocation8_spill] sm:$0xff]  ;;  %vm5088_vm3 = vmmov %vm4843_vm0  ;;  %v2193_v53 = vrot.slane %v1790_v23, 2 }
 0x278   : > { %1906 = vrot.lane.b32.xlu1 %v5085_v51, %s3033_s8  ;;  %v1950_v16 = vadd.f32 %v1933_v57, %v1920_v17  ;;  %2156 = vrot.lane.b32.xlu2 %v4296_v34, %s3033_s8  ;;  %v1071_v37 = vrot.slane %v5087_v13, 4  ;;  %v1678_v25 = vsel %vm5088_vm3, %v1677_v45, %v4199_v62  ;;  %v1863_v34 = vrot.slane %v1862_v44, 4  ;;  %v4564_v13 = vld [vmem:[%s4796_s3 + $0x8] sm:$0xff] }
 0x279   : > { %v2110_v28 = vrot.slane %v1678_v25, 2  ;;  %v2195_v4 = vsel %vm2098_vm8, %v2193_v53, %v2194_v2  ;;  %v2914_v2 = vld [vmem:[%s4795_s2 + $0x2] ss:$0 sm:$0xff]  ;;  %vm2591_vm9 = vcmask 523264  }
 0x27a   : > { %v1987_v55 = vadd.f32 %v4354_v46, %v1950_v16  ;;  %v5089_v46 = vld [vmem:[#allocation12_spill] sm:$0xff]  ;;  %v1072_v14 = vsel %vm5091_vm7, %v5090_v47, %v1071_v37  ;;  %v1864_v62 = vsel %vm5093_vm10, 0.0, %v1863_v34  ;;  %v5097_v37 = vld [vmem:[#allocation23_spill] sm:$0xff] }
 0x27b   : > { %v2112_v50 = vrot.slane %v5089_v46, 2 }
 0x27d   : > { %1908 = vrot.lane.b32.xlu0 %v5086_v24, %s3033_s8  ;;  %v4508_v31 = vsel %vm2098_vm8, %v2110_v28, %v2112_v50 }
 0x280   : > { %2023 = vrot.lane.b32.xlu1 %v4175_v54, %s3033_s8  ;;  %2202 = vrot.lane.b32.xlu2 %v2190_v56, %s3004_s25  ;;  %v1566_v54 = vsel %vm5092_vm11, %v1565_v19, %v5024_v21  ;;  %v2191_v21 = vrot.slane %v1864_v62, 2 }
 0x281   : > { %v2109_v56 = vrot.slane %v1566_v54, 2 }
 0x282   : > { %v2192_v40 = vsel %vm2098_vm8, %v2189_v33, %v2191_v21 }
 0x283   : > { %v4515_v44 = vsel %vm2098_vm8, %v2109_v56, %v2110_v28  ;;  %vm5101_vm8 = vmmov %vm4843_vm0 }
 0x285   : > { %1936 = vrot.lane.b32.xlu0 %v1072_v14, %s3004_s25  ;;  %v4574_v14 = vld [vmem:[%s4796_s3 + $0x10] sm:$0xff] }
 0x288   : > { %2069 = vrot.lane.b32.xlu1 %v4317_v12, %s3004_s25  ;;  %1910 = vrot.lane.b32.xlu2 %v5094_v7, %s3033_s8  ;;  %v5095_v12 = vld [vmem:[#allocation29_spill] sm:$0xff] }
 0x28d   : > { %2071 = vrot.lane.b32.xlu0 %v4311_v49, %s3004_s25 }
 0x290   : > { %2204 = vrot.lane.b32.xlu1 %v2192_v40, %s3004_s25  ;;  %2027 = vrot.lane.b32.xlu2 %v4132_v8, %s3033_s8  ;;  %v5096_v8 = vld [vmem:[#allocation28_spill] sm:$0xff] }
 0x291   : > { %v1891_v58 = vadd.f32 %v1880_v10, %v5096_v8 }
 0x294   : > { %v1905_v49 = vpop.permute.xlu1 %1904 }
 0x295   : > { %2154 = vrot.lane.b32.xlu0 %v4328_v30, %s3033_s8  ;;  %v1921_v30 = vadd.f32 %v1905_v49, %v1891_v58  ;;  %v4590_v49 = vld [vmem:[%s4796_s3 + $0x30] sm:$0xff] }
 0x298   : > { %1912 = vrot.lane.b32.xlu1 %v5095_v12, %s3033_s8  ;;  %2073 = vrot.lane.b32.xlu2 %v4332_v38, %s3004_s25 }
 0x29c   : > { %v1935_v33 = vpop.permute.xlu1 %1934 }
 0x29d   : > { %1887 = vperm.xlu0 %2910, %v2914_v2   ;;  %v1951_v1 = vadd.f32 %v1935_v33, %v1921_v30  ;;  %v2226_v30 = vld [vmem:[%s4796_s3 + $0x20] sm:$0xff] }
 0x29f   : > { %v1988_v38 = vadd.f32 %v4215_v20, %v1951_v1  ;;  %v4600_v1 = vld [vmem:[%s4796_s3 + $0x38] sm:$0xff] }
 0x2a0   : > { %1940 = vrot.lane.b32.xlu1 %v4116_v27, %s3004_s25  ;;  %2208 = vrot.lane.b32.xlu2 %v2197_v41, %s3004_s25  ;;  %v2068_v41 = vpop.permute.xlu2 %2067 }
 0x2a5   : > { %1942 = vrot.lane.b32.xlu0 %v4149_v32, %s3004_s25 }
 0x2a8   : > { %2075 = vrot.lane.b32.xlu1 %v4337_v61, %s3004_s25 }
 0x2ad   : > { %2025 = vrot.lane.b32.xlu0 %v4180_v0, %s3033_s8 }
 0x2b0   : > { %2158 = vrot.lane.b32.xlu1 %v4386_v15, %s3033_s8 }
 0x2b1   : > { %v2020_v27 = vpop.permute.xlu0 %2019  ;;  %v2018_v26 = vpop.permute.xlu1 %2017 }
 0x2b2   : > { %v2036_v10 = vadd.f32 %v2020_v27, %v1988_v38  ;;  %v2035_v36 = vadd.f32 %v2018_v26, %v1987_v55  ;;  %v2151_v0 = vpop.permute.xlu2 %2150  ;;  %v5098_v38 = vld [vmem:[#allocation16_spill] sm:$0xff]  ;;  %v5100_v26 = vld [vmem:[#allocation7_spill] sm:$0xff] }
 0x2b3   : > { %v1061_v27 = vrot.slane %v5098_v38, 4 }
 0x2b4   : > { %v2084_v32 = vadd.f32 %v2068_v41, %v2036_v10  ;;  %v5099_v10 = vld [vmem:[#allocation26_spill] sm:$0xff] }
 0x2b5   : > { %2160 = vrot.lane.b32.xlu0 %v4391_v59, %s3033_s8  ;;  %v1173_v41 = vrot.slane %v5099_v10, 4 }
 0x2b6   : > { %v2121_v6 = vadd.f32 %v2103_v3, %v2084_v32  ;;  %v4556_v3 = vld [vmem:[%s4796_s3] sm:$0xff] }
 0x2b9   : > { %v2066_v61 = vpop.permute.xlu0 %2065 }
 0x2ba   : > { %v2083_v20 = vadd.f32 %v2066_v61, %v2035_v36  ;;  %v1884_v48 = vpop.permute.xlu2 %1883  ;;  %v5102_v36 = vld [vmem:[#allocation25_spill] sm:$0xff] }
 0x2bb   : > { %v1893_v51 = vadd.f32 %v1884_v48, %v4360_v35  ;;  %v1892_v19 = vadd.f32 %v1884_v48, %v5097_v37  ;;  %v1174_v61 = vsel %vm5103_vm12, %v1173_v41, %v5102_v36 }
 0x2bc   : > { %v2120_v39 = vadd.f32 %v4473_v22, %v2083_v20 }
 0x2bd   : > { %2206 = vrot.lane.b32.xlu0 %v2195_v4, %s3004_s25 }
 0x2be   : > { %v2168_v63 = vadd.f32 %v2151_v0, %v2120_v39  ;;  %v2227_v0 = vld [vmem:[%s4796_s3 + $0x28] sm:$0xff] }
 0x2c2   : > { %v1939_v42 = vpop.permute.xlu2 %1938 }
 0x2c5   : > { %v2153_v52 = vpop.permute.xlu1 %2152 }
 0x2c6   : > { %v2169_v5 = vadd.f32 %v2153_v52, %v2121_v6  ;;  %v1062_v6 = vsel %vm5101_vm8, %v1061_v27, %v5100_v26 }
 0x2ca   : > { %v2022_v22 = vpop.permute.xlu2 %2021 }
 0x2d2   : > { %v2157_v28 = vpop.permute.xlu2 %2156 }
 0x2da   : > { %v2203_v7 = vpop.permute.xlu2 %2202 }
 0x2e2   : > { %v2199_v15 = vpop.permute.xlu1 %2198  ;;  %v1911_v33 = vpop.permute.xlu2 %1910 }
 0x2e3   : > { %v2216_v57 = vadd.f32 %v2199_v15, %v2168_v63 }
 0x2e7   : > { %v2201_v59 = vpop.permute.xlu0 %2200 }
 0x2e8   : > { %v2217_v23 = vadd.f32 %v2201_v59, %v2169_v5 }
 0x2ea   : > { %v1907_v17 = vpop.permute.xlu1 %1906  ;;  %2268 = vmatpush.msrb.mxu0 %v2217_v23  ;;  %2782 = vmatpush.msra.mxu3 %v2217_v23  ;;  %v2028_v52 = vpop.permute.xlu2 %2027 }
 0x2eb   : > { %v1922_v34 = vadd.f32 %v1907_v17, %v1892_v19 }
 0x2ec   : > { %2269 = vmatpush.msrb.mxu0 %v2216_v57  ;;  %2783 = vmatpush.msra.mxu3 %v2216_v57 }
 0x2ed   : > { %2730 = vmatmul.msk.f32.vlgmr.msrb.gmra.mxu0 %vm473_vm13, %v4556_v3  ;;  %2736 = vmatmul.msk.f32.vlgmr.msra.gmra.mxu3 %vm473_vm13, %v4590_v49 }
 0x2ef   : > { %v1909_v16 = vpop.permute.xlu0 %1908 }
 0x2f0   : > { %v1923_v55 = vadd.f32 %v1909_v16, %v1893_v51 }
 0x2f2   : > { %v2024_v24 = vpop.permute.xlu1 %2023  ;;  %v1953_v45 = vadd.f32 %v1939_v42, %v1923_v55  ;;  %v2074_v16 = vpop.permute.xlu2 %2073 }
 0x2f4   : > { %v1990_v25 = vadd.f32 %v4409_v43, %v1953_v45 }
 0x2f5   : > { %2731 = vmatmul.msk.f32.gmra.mxu0 %vm473_vm13, %v4564_v13  ;;  %2737 = vmatmul.msk.f32.gmra.mxu3 %vm473_vm13, %v4600_v1 }
 0x2f6   : > { %v2038_v43 = vadd.f32 %v2024_v24, %v1990_v25 }
 0x2f7   : > { %v1937_v46 = vpop.permute.xlu0 %1936 }
 0x2f8   : > { %v1952_v35 = vadd.f32 %v1937_v46, %v1922_v34 }
 0x2fa   : > { %v2070_v50 = vpop.permute.xlu1 %2069  ;;  %v1989_v47 = vadd.f32 %v4412_v29, %v1952_v35  ;;  %v4583_v29 = vld [vmem:[%s4796_s3 + $0x18] sm:$0xff]  ;;  %v2209_v34 = vpop.permute.xlu2 %2208 }
 0x2fc   : > { %v2037_v53 = vadd.f32 %v2022_v22, %v1989_v47 }
 0x2fd   : > { %2732 = vmatmul.msk.f32.gmra.mxu0 %vm473_vm13, %v4574_v14 }
 0x2fe   : > { %v2085_v54 = vadd.f32 %v2070_v50, %v2037_v53 }
 0x2ff   : > { %v2072_v56 = vpop.permute.xlu0 %2071 }
 0x300   : > { %v2086_v4 = vadd.f32 %v2072_v56, %v2038_v43  ;;  %v2122_v62 = vadd.f32 %v4468_v18, %v2085_v54 }
 0x302   : > { %v2205_v21 = vpop.permute.xlu1 %2204  ;;  %v2123_v40 = vadd.f32 %v4465_v60, %v2086_v4 }
 0x304   : > { %v2171_v12 = vadd.f32 %v2157_v28, %v2123_v40 }
 0x305   : > { %2733 = vmatmul.msk.f32.gmra.mxu0 %vm473_vm13, %v4583_v29 }
 0x306   : > { %v2219_v2 = vadd.f32 %v2205_v21, %v2171_v12 }
 0x307   : > { %v2155_v18 = vpop.permute.xlu0 %2154 }
 0x308   : > { %v2170_v60 = vadd.f32 %v2155_v18, %v2122_v62  ;;  %2309 = vmatpush.msra.mxu0 %v2219_v2 }
 0x30a   : > { %v1913_v8 = vpop.permute.xlu1 %1912  ;;  %v2218_v58 = vadd.f32 %v2203_v7, %v2170_v60 }
 0x30c   : > { %2310 = vmatpush.msra.mxu0 %v2218_v58 }
 0x30d   : > { %2734 = vmatmul.msk.f32.gmra.mxu0 %vm473_vm13, %v2226_v30 }
 0x30f   : > { %v1888_v32 = vpop.permute.xlu0 %1887 }
 0x310   : > { %v1894_v20 = vadd.f32 %v1888_v32, %v1062_v6  ;;  %v1895_v39 = vadd.f32 %v1888_v32, %v1174_v61 }
 0x312   : > { %v1941_v48 = vpop.permute.xlu1 %1940  ;;  %v1924_v15 = vadd.f32 %v1911_v33, %v1894_v20  ;;  %v1925_v42 = vadd.f32 %v1913_v8, %v1895_v39 }
 0x314   : > { %v1954_v63 = vadd.f32 %v1941_v48, %v1924_v15 }
 0x315   : > { %2735 = vmatmul.msk.f32.gmra.mxu0 %vm473_vm13, %v2227_v0 }
 0x316   : > { %v1991_v51 = vadd.f32 %v4484_v11, %v1954_v63 }
 0x317   : > { %v1943_v5 = vpop.permute.xlu0 %1942 }
 0x318   : > { %v1955_v59 = vadd.f32 %v1943_v5, %v1925_v42 }
 0x31a   : > { %v1992_v23 = vadd.f32 %v4481_v9, %v1955_v59  ;;  %v2076_v57 = vpop.permute.xlu1 %2075 }
 0x31c   : > { %v2040_v17 = vadd.f32 %v2028_v52, %v1992_v23 }
 0x31d   : > { %2738 = vmatmul.msk.f32.vlgmr.msra.gmra.mxu0 %vm473_vm13, %v4556_v3 }
 0x31e   : > { %v2088_v22 = vadd.f32 %v2076_v57, %v2040_v17 }
 0x31f   : > { %v2026_v55 = vpop.permute.xlu0 %2025 }
 0x320   : > { %v2039_v24 = vadd.f32 %v2026_v55, %v1991_v51  ;;  %v2125_v45 = vadd.f32 %v4508_v31, %v2088_v22  ;;  %v2428_v31 = vld [vmem:[%s4797_s4 + $0x8] sm:$0xff] }
 0x321   : > { %2516 = vmatpush.msrb.mxu2 %v2428_v31  ;;  %2784 = vmatpush.msrb.mxu3 %v2428_v31 }
 0x322   : > { %v2087_v37 = vadd.f32 %v2074_v16, %v2039_v24  ;;  %v2159_v46 = vpop.permute.xlu1 %2158 }
 0x324   : > { %v2124_v19 = vadd.f32 %v4515_v44, %v2087_v37  ;;  %v2427_v44 = vld [vmem:[%s4797_s4] sm:$0xff] }
 0x325   : > { %2739 = vmatmul.msk.f32.gmra.mxu0 %vm473_vm13, %v4564_v13  ;;  %2517 = vmatpush.msrb.mxu2 %v2427_v44 }
 0x326   : > { %v2172_v11 = vadd.f32 %v2159_v46, %v2124_v19  ;;  %2785 = vmatpush.msrb.mxu3 %v2427_v44 }
 0x327   : > { %v2161_v9 = vpop.permute.xlu0 %2160 }
 0x328   : > { %v2173_v25 = vadd.f32 %v2161_v9, %v2125_v45 }
 0x32a   : > { %v2221_v28 = vadd.f32 %v2209_v34, %v2173_v25 }
 0x32c   : > { %2350 = vmatpush.msra.mxu1 %v2221_v28 }
 0x32d   : > { %2740 = vmatmul.msk.f32.gmra.mxu0 %vm473_vm13, %v4574_v14 }
 0x32f   : > { %v2207_v35 = vpop.permute.xlu0 %2206 }
 0x330   : > { %v2220_v50 = vadd.f32 %v2207_v35, %v2172_v11 }
 0x332   : > { %2351 = vmatpush.msra.mxu1 %v2220_v50 }
 0x333   : > { %2746 = vmatmul.msk.f32.vlgmr.msra.gmra.mxu1 %vm473_vm13, %v4556_v3 }
 0x335   : > { %2741 = vmatmul.msk.f32.gmra.mxu0 %vm473_vm13, %v4583_v29 }
 0x33b   : > { %2747 = vmatmul.msk.f32.gmra.mxu1 %vm473_vm13, %v4564_v13 }
 0x33d   : > { %2742 = vmatmul.msk.f32.gmra.mxu0 %vm473_vm13, %v2226_v30 }
 0x343   : > { %2748 = vmatmul.msk.f32.gmra.mxu1 %vm473_vm13, %v4574_v14 }
 0x345   : > { %2743 = vmatmul.msk.f32.gmra.mxu0 %vm473_vm13, %v2227_v0 }
 0x34b   : > { %2749 = vmatmul.msk.f32.gmra.mxu1 %vm473_vm13, %v4583_v29 }
 0x34d   : > { %2744 = vmatmul.msk.f32.gmra.mxu0 %vm473_vm13, %v4590_v49 }
 0x353   : > { %2750 = vmatmul.msk.f32.gmra.mxu1 %vm473_vm13, %v2226_v30 }
 0x355   : > { %2745 = vmatmul.msk.f32.gmra.mxu0 %vm473_vm13, %v4600_v1 }
 0x35b   : > { %2751 = vmatmul.msk.f32.gmra.mxu1 %vm473_vm13, %v2227_v0 }
 0x363   : > { %2752 = vmatmul.msk.f32.gmra.mxu1 %vm473_vm13, %v4590_v49 }
 0x36a   : > { %v2271_v3 = vpop.f32.mrf.mxu0 }
 0x36b   : > { %2377 = vst.msk [vmem:[#allocation2] sm:$0xff] %vm473_vm13, %v2271_v3  ;;  %2753 = vmatmul.msk.f32.gmra.mxu1 %vm473_vm13, %v4600_v1 }
 0x370   : > { %v2289_v62 = vpop.f32.mrf.mxu3 }
 0x371   : > { %2383 = vst.msk [vmem:[#allocation2 + $0x30] sm:$0xff] %vm473_vm13, %v2289_v62 }
 0x372   : > { %v2274_v13 = vpop.f32.mrf.mxu0  ;;  %v2403_v47 = vld [vmem:[#allocation2] sm:$0xff] }
 0x373   : > { %2378 = vst.msk [vmem:[#allocation2 + $0x8] sm:$0xff] %vm473_vm13, %v2274_v13  ;;  %2754 = vmatmul.msk.f32.vlgmr.msrb.gmra.mxu2 %vm473_vm13, %v2403_v47 }
 0x378   : > { %v2292_v40 = vpop.f32.mrf.mxu3  ;;  %v2409_v2 = vld [vmem:[#allocation2 + $0x30] sm:$0xff] }
 0x379   : > { %2384 = vst.msk [vmem:[#allocation2 + $0x38] sm:$0xff] %vm473_vm13, %v2292_v40 }
 0x37a   : > { %v2277_v14 = vpop.f32.mrf.mxu0  ;;  %v2404_v53 = vld [vmem:[#allocation2 + $0x8] sm:$0xff] }
 0x37b   : > { %2379 = vst.msk [vmem:[#allocation2 + $0x10] sm:$0xff] %vm473_vm13, %v2277_v14  ;;  %2755 = vmatmul.msk.f32.gmra.mxu2 %vm473_vm13, %v2404_v53 }
 0x380   : > { %v2410_v18 = vld [vmem:[#allocation2 + $0x38] sm:$0xff] }
 0x382   : > { %v2280_v43 = vpop.f32.mrf.mxu0  ;;  %v2405_v54 = vld [vmem:[#allocation2 + $0x10] sm:$0xff] }
 0x383   : > { %2380 = vst.msk [vmem:[#allocation2 + $0x18] sm:$0xff] %vm473_vm13, %v2280_v43  ;;  %2756 = vmatmul.msk.f32.gmra.mxu2 %vm473_vm13, %v2405_v54 }
 0x38a   : > { %v2283_v56 = vpop.f32.mrf.mxu0  ;;  %v2406_v4 = vld [vmem:[#allocation2 + $0x18] sm:$0xff] }
 0x38b   : > { %2381 = vst.msk [vmem:[#allocation2 + $0x20] sm:$0xff] %vm473_vm13, %v2283_v56  ;;  %2757 = vmatmul.msk.f32.gmra.mxu2 %vm473_vm13, %v2406_v4 }
 0x392   : > { %v2286_v7 = vpop.f32.mrf.mxu0  ;;  %v2407_v21 = vld [vmem:[#allocation2 + $0x20] sm:$0xff] }
 0x393   : > { %2382 = vst.msk [vmem:[#allocation2 + $0x28] sm:$0xff] %vm473_vm13, %v2286_v7  ;;  %2758 = vmatmul.msk.f32.gmra.mxu2 %vm473_vm13, %v2407_v21 }
 0x39a   : > { %v2408_v29 = vld [vmem:[#allocation2 + $0x28] sm:$0xff]  ;;  %v2312_v12 = vpop.f32.mrf.mxu0 }
 0x39b   : > { %2759 = vmatmul.msk.f32.gmra.mxu2 %vm473_vm13, %v2408_v29  ;;  %2385 = vst.msk [vmem:[#allocation2 + $0x40] sm:$0xff] %vm473_vm13, %v2312_v12 }
 0x3a2   : > { %v2315_v49 = vpop.f32.mrf.mxu0  ;;  %v2411_v8 = vld [vmem:[#allocation2 + $0x40] sm:$0xff] }
 0x3a3   : > { %2760 = vmatmul.msk.f32.gmra.mxu2 %vm473_vm13, %v2409_v2  ;;  %2386 = vst.msk [vmem:[#allocation2 + $0x48] sm:$0xff] %vm473_vm13, %v2315_v49 }
 0x3aa   : > { %v2318_v60 = vpop.f32.mrf.mxu0  ;;  %v2412_v33 = vld [vmem:[#allocation2 + $0x48] sm:$0xff] }
 0x3ab   : > { %2761 = vmatmul.msk.f32.gmra.mxu2 %vm473_vm13, %v2410_v18  ;;  %2387 = vst.msk [vmem:[#allocation2 + $0x50] sm:$0xff] %vm473_vm13, %v2318_v60 }
 0x3b0   : > { %v2353_v30 = vpop.f32.mrf.mxu1 }
 0x3b1   : > { %2393 = vst.msk [vmem:[#allocation2 + $0x80] sm:$0xff] %vm473_vm13, %v2353_v30 }
 0x3b2   : > { %v2321_v58 = vpop.f32.mrf.mxu0  ;;  %v2413_v10 = vld [vmem:[#allocation2 + $0x50] sm:$0xff] }
 0x3b3   : > { %2762 = vmatmul.msk.f32.gmra.mxu2 %vm473_vm13, %v2411_v8  ;;  %2388 = vst.msk [vmem:[#allocation2 + $0x58] sm:$0xff] %vm473_vm13, %v2321_v58 }
 0x3b8   : > { %v2356_v27 = vpop.f32.mrf.mxu1  ;;  %v2419_v48 = vld [vmem:[#allocation2 + $0x80] sm:$0xff] }
 0x3b9   : > { %2394 = vst.msk [vmem:[#allocation2 + $0x88] sm:$0xff] %vm473_vm13, %v2356_v27 }
 0x3ba   : > { %v2324_v1 = vpop.f32.mrf.mxu0  ;;  %v2414_v38 = vld [vmem:[#allocation2 + $0x58] sm:$0xff] }
 0x3bb   : > { %2763 = vmatmul.msk.f32.gmra.mxu2 %vm473_vm13, %v2412_v33  ;;  %2389 = vst.msk [vmem:[#allocation2 + $0x60] sm:$0xff] %vm473_vm13, %v2324_v1  ;;  %2765 = vmatmul.msk.f32.vlgmr.msrb.gmra.mxu3 %vm473_vm13, %v2414_v38 }
 0x3c0   : > { %v2359_v20 = vpop.f32.mrf.mxu1  ;;  %v2420_v15 = vld [vmem:[#allocation2 + $0x88] sm:$0xff] }
 0x3c1   : > { %2395 = vst.msk [vmem:[#allocation2 + $0x90] sm:$0xff] %vm473_vm13, %v2359_v20 }
 0x3c2   : > { %v2327_v41 = vpop.f32.mrf.mxu0  ;;  %v2415_v32 = vld [vmem:[#allocation2 + $0x60] sm:$0xff] }
 0x3c3   : > { %2764 = vmatmul.msk.f32.gmra.mxu2 %vm473_vm13, %v2413_v10  ;;  %2390 = vst.msk [vmem:[#allocation2 + $0x68] sm:$0xff] %vm473_vm13, %v2327_v41  ;;  %2766 = vmatmul.msk.f32.gmra.mxu3 %vm473_vm13, %v2415_v32 }
 0x3c8   : > { %v2362_v0 = vpop.f32.mrf.mxu1  ;;  %v2421_v5 = vld [vmem:[#allocation2 + $0x90] sm:$0xff] }
 0x3c9   : > { %2396 = vst.msk [vmem:[#allocation2 + $0x98] sm:$0xff] %vm473_vm13, %v2362_v0 }
 0x3ca   : > { %v2330_v26 = vpop.f32.mrf.mxu0  ;;  %v2416_v6 = vld [vmem:[#allocation2 + $0x68] sm:$0xff] }
 0x3cb   : > { %2391 = vst.msk [vmem:[#allocation2 + $0x70] sm:$0xff] %vm473_vm13, %v2330_v26  ;;  %2767 = vmatmul.msk.f32.gmra.mxu3 %vm473_vm13, %v2416_v6 }
 0x3d0   : > { %v2365_v52 = vpop.f32.mrf.mxu1  ;;  %v2422_v23 = vld [vmem:[#allocation2 + $0x98] sm:$0xff] }
 0x3d1   : > { %2397 = vst.msk [vmem:[#allocation2 + $0xa0] sm:$0xff] %vm473_vm13, %v2365_v52 }
 0x3d2   : > { %v2333_v36 = vpop.f32.mrf.mxu0  ;;  %v2417_v61 = vld [vmem:[#allocation2 + $0x70] sm:$0xff] }
 0x3d3   : > { %2392 = vst.msk [vmem:[#allocation2 + $0x78] sm:$0xff] %vm473_vm13, %v2333_v36  ;;  %2768 = vmatmul.msk.f32.gmra.mxu3 %vm473_vm13, %v2417_v61 }
 0x3d8   : > { %v2368_v42 = vpop.f32.mrf.mxu1  ;;  %v2423_v22 = vld [vmem:[#allocation2 + $0xa0] sm:$0xff] }
 0x3d9   : > { %2398 = vst.msk [vmem:[#allocation2 + $0xa8] sm:$0xff] %vm473_vm13, %v2368_v42 }
 0x3da   : > { %v2418_v39 = vld [vmem:[#allocation2 + $0x78] sm:$0xff] }
 0x3db   : > { %2769 = vmatmul.msk.f32.gmra.mxu3 %vm473_vm13, %v2418_v39 }
 0x3e0   : > { %v2371_v63 = vpop.f32.mrf.mxu1  ;;  %v2424_v16 = vld [vmem:[#allocation2 + $0xa8] sm:$0xff] }
 0x3e1   : > { %2399 = vst.msk [vmem:[#allocation2 + $0xb0] sm:$0xff] %vm473_vm13, %v2371_v63 }
 0x3e3   : > { %2770 = vmatmul.msk.f32.gmra.mxu3 %vm473_vm13, %v2419_v48 }
 0x3e8   : > { %v2374_v57 = vpop.f32.mrf.mxu1  ;;  %v2425_v24 = vld [vmem:[#allocation2 + $0xb0] sm:$0xff] }
 0x3e9   : > { %2400 = vst.msk [vmem:[#allocation2 + $0xb8] sm:$0xff] %vm473_vm13, %v2374_v57 }
 0x3eb   : > { %2771 = vmatmul.msk.f32.gmra.mxu3 %vm473_vm13, %v2420_v15 }
 0x3f0   : > { %v2426_v37 = vld [vmem:[#allocation2 + $0xb8] sm:$0xff] }
 0x3f3   : > { %2772 = vmatmul.msk.f32.gmra.mxu3 %vm473_vm13, %v2421_v5 }
 0x3f6   : > { %v2519_v59 = vpop.f32.mrf.mxu2 }
 0x3f7   : > { %2592 = vst.msk [vmem:[%s4697_s10] sm:$0xff] %vm2591_vm9, %v2519_v59 }
 0x3fb   : > { %2773 = vmatmul.msk.f32.gmra.mxu3 %vm473_vm13, %v2422_v23 }
 0x3fe   : > { %v2522_v17 = vpop.f32.mrf.mxu2 }
 0x3ff   : > { %2593 = vst.msk [vmem:[%s4697_s10 + $0x8] sm:$0xff] %vm2591_vm9, %v2522_v17 }
 0x403   : > { %2774 = vmatmul.msk.f32.gmra.mxu3 %vm473_vm13, %v2423_v22 }
 0x406   : > { %v2525_v51 = vpop.f32.mrf.mxu2 }
 0x407   : > { %2594 = vst.msk [vmem:[%s4697_s10 + $0x10] sm:$0xff] %vm2591_vm9, %v2525_v51 }
 0x40b   : > { %2775 = vmatmul.msk.f32.gmra.mxu3 %vm473_vm13, %v2424_v16 }
 0x40e   : > { %v2528_v55 = vpop.f32.mrf.mxu2 }
 0x40f   : > { %2595 = vst.msk [vmem:[%s4697_s10 + $0x18] sm:$0xff] %vm2591_vm9, %v2528_v55 }
 0x413   : > { %2776 = vmatmul.msk.f32.gmra.mxu3 %vm473_vm13, %v2425_v24 }
 0x416   : > { %v2531_v45 = vpop.f32.mrf.mxu2 }
 0x417   : > { %2596 = vst.msk [vmem:[%s4697_s10 + $0x20] sm:$0xff] %vm2591_vm9, %v2531_v45 }
 0x41b   : > { %2777 = vmatmul.msk.f32.gmra.mxu3 %vm473_vm13, %v2426_v37 }
 0x41e   : > { %v2534_v19 = vpop.f32.mrf.mxu2 }
 0x41f   : > { %2597 = vst.msk [vmem:[%s4697_s10 + $0x28] sm:$0xff] %vm2591_vm9, %v2534_v19 }
 0x426   : > { %v2537_v9 = vpop.f32.mrf.mxu2 }
 0x427   : > { %2598 = vst.msk [vmem:[%s4697_s10 + $0x30] sm:$0xff] %vm2591_vm9, %v2537_v9 }
 0x42e   : > { %v2540_v25 = vpop.f32.mrf.mxu2 }
 0x42f   : > { %2599 = vst.msk [vmem:[%s4697_s10 + $0x38] sm:$0xff] %vm2591_vm9, %v2540_v25 }
 0x436   : > { %v2543_v34 = vpop.f32.mrf.mxu2 }
 0x437   : > { %2600 = vst.msk [vmem:[%s4697_s10 + $0x40] sm:$0xff] %vm2591_vm9, %v2543_v34 }
 0x43e   : > { %v2546_v28 = vpop.f32.mrf.mxu2  ;;  %v2552_v46 = vpop.f32.mrf.mxu3 }
 0x43f   : > { %2601 = vst.msk [vmem:[%s4697_s10 + $0x48] sm:$0xff] %vm2591_vm9, %v2546_v28 }
 0x440   : > { %2603 = vst.msk [vmem:[%s4697_s10 + $0x58] sm:$0xff] %vm2591_vm9, %v2552_v46 }
 0x446   : > { %v2549_v11 = vpop.f32.mrf.mxu2  ;;  %v2555_v35 = vpop.f32.mrf.mxu3 }
 0x447   : > { %2602 = vst.msk [vmem:[%s4697_s10 + $0x50] sm:$0xff] %vm2591_vm9, %v2549_v11 }
 0x448   : > { %2604 = vst.msk [vmem:[%s4697_s10 + $0x60] sm:$0xff] %vm2591_vm9, %v2555_v35 }
 0x44e   : > { %v2558_v50 = vpop.f32.mrf.mxu3 }
 0x44f   : > { %2605 = vst.msk [vmem:[%s4697_s10 + $0x68] sm:$0xff] %vm2591_vm9, %v2558_v50 }
 0x456   : > { %v2561_v31 = vpop.f32.mrf.mxu3 }
 0x457   : > { %2606 = vst.msk [vmem:[%s4697_s10 + $0x70] sm:$0xff] %vm2591_vm9, %v2561_v31 }
 0x45e   : > { %v2564_v44 = vpop.f32.mrf.mxu3 }
 0x45f   : > { %2607 = vst.msk [vmem:[%s4697_s10 + $0x78] sm:$0xff] %vm2591_vm9, %v2564_v44 }
 0x466   : > { %v2567_v3 = vpop.f32.mrf.mxu3 }
 0x467   : > { %2608 = vst.msk [vmem:[%s4697_s10 + $0x80] sm:$0xff] %vm2591_vm9, %v2567_v3 }
 0x46e   : > { %v2570_v13 = vpop.f32.mrf.mxu3 }
 0x46f   : > { %2609 = vst.msk [vmem:[%s4697_s10 + $0x88] sm:$0xff] %vm2591_vm9, %v2570_v13 }
 0x476   : > { %v2573_v47 = vpop.f32.mrf.mxu3 }
 0x477   : > { %2610 = vst.msk [vmem:[%s4697_s10 + $0x90] sm:$0xff] %vm2591_vm9, %v2573_v47 }
 0x47e   : > { %v2576_v14 = vpop.f32.mrf.mxu3 }
 0x47f   : > { %2611 = vst.msk [vmem:[%s4697_s10 + $0x98] sm:$0xff] %vm2591_vm9, %v2576_v14 }
 0x486   : > { %v2579_v53 = vpop.f32.mrf.mxu3 }
 0x487   : > { %2612 = vst.msk [vmem:[%s4697_s10 + $0xa0] sm:$0xff] %vm2591_vm9, %v2579_v53 }
 0x48e   : > { %v2582_v43 = vpop.f32.mrf.mxu3 }
 0x48f   : > { %2613 = vst.msk [vmem:[%s4697_s10 + $0xa8] sm:$0xff] %vm2591_vm9, %v2582_v43 }
 0x496   : > { %v2585_v54 = vpop.f32.mrf.mxu3 }
 0x497   : > { %2614 = vst.msk [vmem:[%s4697_s10 + $0xb0] sm:$0xff] %vm2591_vm9, %v2585_v54 }
 0x49e   : > { %v2588_v56 = vpop.f32.mrf.mxu3 }
 0x49f   : > { %2615 = vst.msk [vmem:[%s4697_s10 + $0xb8] sm:$0xff] %vm2591_vm9, %v2588_v56 }
 0x4a0   : > { %2942 = shalt.err (!%p2939_p5)
}
 0x4a1   : > { %s3034_s7 = smov 128   ;;  %s3035_s10 = smov 8  }
 0x4a2   : > { %2789 = dma.vmem_to_hbm [thread:$0]  (%p3106_p4), %s2632_s13, 3072, %s2634_s14, %s2617_s15, %s3034_s7, %s3034_s7, %s3035_s10  }
 0x4a3 PF: > { %p2795_p6 = scmp.ge.s32.totalorder %s2993_s23, 2  ;;  %s2648_s11 = sand.u32 1, %s2973_s18  }
 0x4a4   : > { %s2649_s16 = scalar_lea.sflag [#allocation4], %s2648_s11 }
 0x4a5   : > { %p2792_p7 = pnand %p2795_p6, %p3113_p8 }
 0x4a7   : > { %p2793_p9 = pneg %p2792_p7 }
 0x4a9   : > { %2968 = dma.done.wait (%p2793_p9), %s2649_s16, 3072  }
 0x4aa   : > { %2970 = vsyncadd (%p2793_p9), %s2649_s16, 4294964224  ;;  %s18_s23 = sadd.s32 1, %s2993_s23   ;;  %s5104_s18 = smov %s2977_s19 }
 0x4ab   : > { %p15_p10 = scmp.ge.s32.totalorder %s18_s23, 4   ;;  %s5105_s19 = smov %s2981_s20 }
 0x4ac   : > { %s5106_s20 = smov %s3119_s6  ;;  %s5107_s21 = smov %s2989_s22 }
 0x4ad   : > { %s5108_s22 = smov %s5110_s26  ;;  %17 = sbr.rel (!%p15_p10) target bundleno = 4 (0x4), region = 80 }
 0x4b2   :  { %2655 = vsyncpa [#allocation4], 1 }
 0x4b3   :  { %2657 = vsyncpa [#allocation4 + $0x1], 1 }

</bundles_post_ra>
